<compile_context>
chip_gen: v7x
topology: tpu7x:2x2x1
jax: 0.10.0
libtpu: 0.0.40
codegen_flags: <defaults>
</compile_context>

<pallas_src>
import functools

import jax
import jax.numpy as jnp
from jax import lax
from jax.experimental import pallas as pl
from jax.experimental.pallas import tpu as pltpu


def basic_block_kernel(x_ref, w1_ref, b1_ref, w2_ref, b2_ref, out_ref, *, H, W):
    """One batch-block per grid step, channels-first, batch+spatial flattened on lanes.

    x_ref:   (Cin, B*H*W)    bf16 input (lane axis = B*H*W); also the residual
    w1_ref:  (9, Cout, Cin)  conv1 weights, bn1 scale folded, tap-major, bf16
    b1_ref:  (Cout, 1)       folded bn1 shift (f32)
    w2_ref:  (9, Cout, Cout) conv2 weights, bn2 scale folded, bf16
    b2_ref:  (Cout, 1)       folded bn2 shift (f32)
    out_ref: (Cout, B*H*W)   f32
    """
    HW = H * W
    BHW = x_ref.shape[1]
    Cout = w1_ref.shape[1]

    # Loaded once: conv1 source, residual (promoted to f32 once).
    xf = x_ref[...].astype(jnp.float32)                       # (Cin, BHW)

    # Per-image boundary masks, computed ONCE and shared by both convs.  Tap (dh, dw) in
    # {0,1,2}^2 is a flat shift of (dh-1)*W + (dw-1); a circular roll brings out-of-image
    # (and cross-image) neighbours back into range and these masks zero exactly those lanes.
    pos_im = lax.broadcasted_iota(jnp.int32, (1, BHW), 1) % HW
    col = pos_im % W
    row_ok = (pos_im >= W, None, pos_im < HW - W)             # dh = 0, 1, 2
    col_ok = (col != 0, None, col != W - 1)                   # dw = 0, 1, 2
    taps_meta = []                                            # (flat offset, combined mask)
    for dh in range(3):
        for dw in range(3):
            m = row_ok[dh]
            if col_ok[dw] is not None:
                m = col_ok[dw] if m is None else (m & col_ok[dw])
            taps_meta.append(((dh - 1) * W + (dw - 1), m))

    def conv3x3_acc(src_f32, w_ref, b_ref):
        """3x3 conv (+ folded BN) as 9 accumulating MXU dots; bias seeds the accumulator."""
        acc = jnp.broadcast_to(b_ref[...], (Cout, BHW))       # f32 accumulator init = shift
        for t, (off, m) in enumerate(taps_meta):
            # want tap[:, p] = src[:, p + off] (zero outside the image)
            tap = src_f32 if off == 0 else pltpu.roll(src_f32, (-off) % BHW, axis=1)
            if m is not None:
                tap = jnp.where(m, tap, 0.0)
            acc = acc + jnp.dot(w_ref[t], tap.astype(jnp.bfloat16),
                                preferred_element_type=jnp.float32)
        return acc

    # ---- conv1 + bn1 + relu
    y = jnp.maximum(conv3x3_acc(xf, w1_ref, b1_ref), 0.0)     # (Cout, BHW) f32
    # ---- conv2 + bn2
    z = conv3x3_acc(y, w2_ref, b2_ref)                        # (Cout, BHW) f32
    # ---- residual add + relu; lane-dense store
    out_ref[...] = jnp.maximum(z + xf, 0.0)


def _pick_batch_block(N, Cin, Cout, HW, act_budget_bytes=8 << 20):
    """Largest batch block (divisor of N) whose live activations fit the budget and whose
    lane width is a multiple of 128 (or the full array)."""
    per_img = (Cin + 3 * Cout) * HW * 4 + (Cin + Cout) * HW * 2
    target = max(1, min(N, act_budget_bytes // max(per_img, 1)))
    for b in range(int(target), 0, -1):
        if N % b == 0 and (b == N or (b * HW) % 128 == 0):
            return b
    return 1


def basic_block_forward(x_nchw, params, eps=1e-5):
    """Pallas forward for BasicBlock(inplanes=planes, stride=1, downsample=None)."""
    (w1, g1, be1, rm1, rv1, w2, g2, be2, rm2, rv2) = params

    N, Cin, H, W = x_nchw.shape
    Cout = w1.shape[0]
    assert Cin == Cout, "identity-residual path requires inplanes == planes"
    HW = H * W

    # Eval-mode BN folded into the conv weights (per-output-channel scale) + shift.
    s1 = g1 / jnp.sqrt(rv1 + eps)
    s2 = g2 / jnp.sqrt(rv2 + eps)
    b1 = (be1 - rm1 * s1).reshape(Cout, 1).astype(jnp.float32)
    b2 = (be2 - rm2 * s2).reshape(Cout, 1).astype(jnp.float32)

    # PyTorch OIHW -> tap-major (9, Cout, Cin) with tap order (kh, kw), BN scale folded in,
    # bf16 (MXU native); accumulation stays f32 in-kernel.
    w1_t = ((w1 * s1[:, None, None, None]).transpose(2, 3, 0, 1)
            .reshape(9, Cout, Cin).astype(jnp.bfloat16))
    w2_t = ((w2 * s2[:, None, None, None]).transpose(2, 3, 0, 1)
            .reshape(9, Cout, Cout).astype(jnp.bfloat16))

    # Channels-first, batch+spatial flattened onto lanes; bf16 at the DMA boundary
    # (halves HBM bytes; promoted to f32 in-kernel only where needed).
    x_flat = x_nchw.transpose(1, 0, 2, 3).reshape(Cin, N * HW).astype(jnp.bfloat16)

    B_blk = _pick_batch_block(N, Cin, Cout, HW)
    BHW = B_blk * HW
    grid = (N // B_blk,)

    kernel = functools.partial(basic_block_kernel, H=H, W=W)

    # VMEM budget from the real per-step footprint (double-buffered I/O blocks + weights +
    # in-kernel temporaries), 2x headroom; floor 4 MiB, cap 48 MiB (< v7x's 64 MiB physical).
    io_bytes = 2 * (Cin * BHW * 2) + 2 * (Cout * BHW * 4)
    w_bytes = 2 * 9 * (Cout * Cin + Cout * Cout) * 2 + 2 * 2 * Cout * 128 * 4
    tmp_bytes = (Cin * BHW * 4            # xf (conv1 source + residual)
                 + 2 * Cout * BHW * 4     # y + accumulator
                 + max(Cin, Cout) * BHW * (4 + 2)   # one rolled/masked tap + bf16 cast
                 + 4 * BHW * 4)           # iota / masks
    per_step = io_bytes + w_bytes + 2 * tmp_bytes
    vmem_limit = int(min(max(per_step, 4 * 1024 * 1024), 48 * 1024 * 1024))

    out_flat = pl.pallas_call(
        kernel,
        out_shape=jax.ShapeDtypeStruct((Cout, N * HW), jnp.float32),
        grid_spec=pltpu.PrefetchScalarGridSpec(
            num_scalar_prefetch=0,
            grid=grid,
            in_specs=[
                pl.BlockSpec((Cin, BHW), lambda n: (0, n)),
                pl.BlockSpec((9, Cout, Cin), lambda n: (0, 0, 0)),
                pl.BlockSpec((Cout, 1), lambda n: (0, 0)),
                pl.BlockSpec((9, Cout, Cout), lambda n: (0, 0, 0)),
                pl.BlockSpec((Cout, 1), lambda n: (0, 0)),
            ],
            out_specs=pl.BlockSpec((Cout, BHW), lambda n: (0, n)),
        ),
        compiler_params=pltpu.CompilerParams(
            dimension_semantics=("parallel",),   # independent batch blocks (v7x 2-TC split)
            vmem_limit_bytes=vmem_limit,
        ),
    )(x_flat, w1_t, b1, w2_t, b2)

    # (Cout, N*HW) -> NCHW
    return out_flat.reshape(Cout, N, H, W).transpose(1, 0, 2, 3)


def ref_basic_block(x, params, eps=1e-5):
    """Pure-JAX reference (lax.conv, f32) for correctness checking."""
    (w1, g1, be1, rm1, rv1, w2, g2, be2, rm2, rv2) = params

    def conv(inp, w):
        return lax.conv_general_dilated(
            inp, w, window_strides=(1, 1), padding="SAME",
            dimension_numbers=("NCHW", "OIHW", "NCHW"))

    def bn(inp, g, b, rm, rv):
        inv = g / jnp.sqrt(rv + eps)
        return inp * inv[None, :, None, None] + (b - rm * inv)[None, :, None, None]

    out = jax.nn.relu(bn(conv(x, w1), g1, be1, rm1, rv1))
    out = bn(conv(out, w2), g2, be2, rm2, rv2)
    return jax.nn.relu(out + x)


def make_params(key, inplanes, planes):
    ks = jax.random.split(key, 10)
    w1 = 0.1 * jax.random.normal(ks[0], (planes, inplanes, 3, 3), jnp.float32)
    g1 = 1.0 + 0.1 * jax.random.normal(ks[1], (planes,), jnp.float32)
    be1 = 0.1 * jax.random.normal(ks[2], (planes,), jnp.float32)
    rm1 = 0.1 * jax.random.normal(ks[3], (planes,), jnp.float32)
    rv1 = jax.random.uniform(ks[4], (planes,), jnp.float32, 0.5, 1.5)
    w2 = 0.1 * jax.random.normal(ks[5], (planes, planes, 3, 3), jnp.float32)
    g2 = 1.0 + 0.1 * jax.random.normal(ks[6], (planes,), jnp.float32)
    be2 = 0.1 * jax.random.normal(ks[7], (planes,), jnp.float32)
    rm2 = 0.1 * jax.random.normal(ks[8], (planes,), jnp.float32)
    rv2 = jax.random.uniform(ks[9], (planes,), jnp.float32, 0.5, 1.5)
    return (w1, g1, be1, rm1, rv1, w2, g2, be2, rm2, rv2)


if __name__ == "__main__":
    key = jax.random.PRNGKey(0)
    k_x, k_p = jax.random.split(key)

    N, C, H, W = 2, 8, 16, 16          # inplanes == planes, stride=1, downsample=None
    x = jax.random.normal(k_x, (N, C, H, W), jnp.float32)   # NCHW, like PyTorch
    params = make_params(k_p, C, C)

    out = jax.block_until_ready(basic_block_forward(x, params))
    ref = jax.block_until_ready(ref_basic_block(x, params))

    assert out.shape == (N, C, H, W), out.shape
    max_err = float(jnp.max(jnp.abs(out - ref)))
    # bf16 input + bf16 MXU operands (f32 accumulation): loosened tolerance vs pure-f32.
    assert max_err < 5e-2, f"mismatch vs reference: {max_err}"

    print("KERNEL_OK")
</pallas_src>

<mosaic_0001>
module attributes {stable_mosaic.version = 11 : i64} {
  func.func @basic_block_kernel(%arg0: i32, %arg1: memref<8x512xbf16, #tpu.memory_space<vmem>>, %arg2: memref<9x8x8xbf16, #tpu.memory_space<vmem>>, %arg3: memref<8x1xf32, #tpu.memory_space<vmem>>, %arg4: memref<9x8x8xbf16, #tpu.memory_space<vmem>>, %arg5: memref<8x1xf32, #tpu.memory_space<vmem>>, %arg6: memref<8x512xf32, #tpu.memory_space<vmem>>) attributes {dimension_semantics = [#tpu.dimension_semantics<parallel>], iteration_bounds = array<i64: 1>, scalar_prefetch = 0 : i64, scratch_operands = 0 : i64, tpu.core_type = #tpu.core_type<tc>, window_params = [{transform_indices = @transform_0, window_bounds = array<i64: 8, 512>}, {pipeline_mode = #tpu.pipeline_mode<synchronous>, transform_indices = @transform_1, window_bounds = array<i64: 9, 8, 8>}, {pipeline_mode = #tpu.pipeline_mode<synchronous>, transform_indices = @transform_2, window_bounds = array<i64: 8, 1>}, {pipeline_mode = #tpu.pipeline_mode<synchronous>, transform_indices = @transform_3, window_bounds = array<i64: 9, 8, 8>}, {pipeline_mode = #tpu.pipeline_mode<synchronous>, transform_indices = @transform_4, window_bounds = array<i64: 8, 1>}, {transform_indices = @transform_5, window_bounds = array<i64: 8, 512>}]} {
    %c0 = arith.constant 0 : index
    %c0_0 = arith.constant 0 : index
    %0 = vector.load %arg1[%c0, %c0_0] : memref<8x512xbf16, #tpu.memory_space<vmem>>, vector<8x512xbf16>
    %1 = arith.extf %0 : vector<8x512xbf16> to vector<8x512xf32>
    %2 = tpu.iota {dimensions = array<i32: 1>} : vector<1x512xi32>
    %c256_i32 = arith.constant 256 : i32
    %c0_i32 = arith.constant 0 : i32
    %3 = arith.cmpi eq, %c256_i32, %c0_i32 : i32
    %c1_i32 = arith.constant 1 : i32
    %4 = arith.select %3, %c1_i32, %c256_i32 : i32
    %5 = vector.broadcast %4 : i32 to vector<1x512xi32>
    %6 = arith.remsi %2, %5 : vector<1x512xi32>
    %c0_i32_1 = arith.constant 0 : i32
    %7 = vector.broadcast %c0_i32_1 : i32 to vector<1x512xi32>
    %8 = arith.cmpi ne, %6, %7 : vector<1x512xi32>
    %c0_i32_2 = arith.constant 0 : i32
    %9 = vector.broadcast %c0_i32_2 : i32 to vector<1x512xi32>
    %10 = arith.cmpi slt, %6, %9 : vector<1x512xi32>
    %c0_i32_3 = arith.constant 0 : i32
    %11 = arith.cmpi slt, %4, %c0_i32_3 : i32
    %12 = vector.broadcast %11 : i1 to vector<1x512xi1>
    %13 = vector.broadcast %12 : vector<1x512xi1> to vector<1x512xi1>
    %14 = arith.xori %10, %13 : vector<1x512xi1>
    %15 = arith.andi %14, %8 : vector<1x512xi1>
    %16 = vector.broadcast %4 : i32 to vector<1x512xi32>
    %17 = arith.addi %6, %16 : vector<1x512xi32>
    %18 = arith.select %15, %17, %6 : vector<1x512xi1>, vector<1x512xi32>
    %c16_i32 = arith.constant 16 : i32
    %c0_i32_4 = arith.constant 0 : i32
    %19 = arith.cmpi eq, %c16_i32, %c0_i32_4 : i32
    %c1_i32_5 = arith.constant 1 : i32
    %20 = arith.select %19, %c1_i32_5, %c16_i32 : i32
    %21 = vector.broadcast %20 : i32 to vector<1x512xi32>
    %22 = arith.remsi %18, %21 : vector<1x512xi32>
    %c0_i32_6 = arith.constant 0 : i32
    %23 = vector.broadcast %c0_i32_6 : i32 to vector<1x512xi32>
    %24 = arith.cmpi ne, %22, %23 : vector<1x512xi32>
    %c0_i32_7 = arith.constant 0 : i32
    %25 = vector.broadcast %c0_i32_7 : i32 to vector<1x512xi32>
    %26 = arith.cmpi slt, %22, %25 : vector<1x512xi32>
    %c0_i32_8 = arith.constant 0 : i32
    %27 = arith.cmpi slt, %20, %c0_i32_8 : i32
    %28 = vector.broadcast %27 : i1 to vector<1x512xi1>
    %29 = vector.broadcast %28 : vector<1x512xi1> to vector<1x512xi1>
    %30 = arith.xori %26, %29 : vector<1x512xi1>
    %31 = arith.andi %30, %24 : vector<1x512xi1>
    %32 = vector.broadcast %20 : i32 to vector<1x512xi32>
    %33 = arith.addi %22, %32 : vector<1x512xi32>
    %34 = arith.select %31, %33, %22 : vector<1x512xi1>, vector<1x512xi32>
    %c16_i32_9 = arith.constant 16 : i32
    %35 = vector.broadcast %c16_i32_9 : i32 to vector<1x512xi32>
    %36 = arith.cmpi sge, %18, %35 : vector<1x512xi32>
    %c240_i32 = arith.constant 240 : i32
    %37 = vector.broadcast %c240_i32 : i32 to vector<1x512xi32>
    %38 = arith.cmpi slt, %18, %37 : vector<1x512xi32>
    %c0_i32_10 = arith.constant 0 : i32
    %39 = vector.broadcast %c0_i32_10 : i32 to vector<1x512xi32>
    %40 = arith.cmpi ne, %34, %39 : vector<1x512xi32>
    %c15_i32 = arith.constant 15 : i32
    %41 = vector.broadcast %c15_i32 : i32 to vector<1x512xi32>
    %42 = arith.cmpi ne, %34, %41 : vector<1x512xi32>
    %43 = arith.andi %36, %40 : vector<1x512xi1>
    %44 = arith.andi %36, %42 : vector<1x512xi1>
    %45 = arith.andi %38, %40 : vector<1x512xi1>
    %46 = arith.andi %38, %42 : vector<1x512xi1>
    %c0_11 = arith.constant 0 : index
    %c0_12 = arith.constant 0 : index
    %47 = vector.load %arg3[%c0_11, %c0_12] : memref<8x1xf32, #tpu.memory_space<vmem>>, vector<8x1xf32>
    %48 = vector.shape_cast %47 : vector<8x1xf32> to vector<8x1xf32>
    %49 = vector.broadcast %48 : vector<8x1xf32> to vector<8x512xf32>
    %c17_i32 = arith.constant 17 : i32
    %50 = tpu.dynamic_rotate %1 by %c17_i32 dim 1 : vector<8x512xf32>, i32 -> vector<8x512xf32>
    %cst = arith.constant 0.000000e+00 : f32
    %51 = vector.shape_cast %43 : vector<1x512xi1> to vector<1x512xi1>
    %52 = vector.broadcast %51 : vector<1x512xi1> to vector<8x512xi1>
    %53 = vector.broadcast %cst : f32 to vector<8x512xf32>
    %54 = arith.select %52, %50, %53 : vector<8x512xi1>, vector<8x512xf32>
    %c0_13 = arith.constant 0 : index
    %c0_14 = arith.constant 0 : index
    %c0_15 = arith.constant 0 : index
    %55 = vector.load %arg2[%c0_13, %c0_14, %c0_15] : memref<9x8x8xbf16, #tpu.memory_space<vmem>>, vector<1x8x8xbf16>
    %56 = vector.shape_cast %55 : vector<1x8x8xbf16> to vector<8x8xbf16>
    %57 = arith.truncf %54 : vector<8x512xf32> to vector<8x512xbf16>
    %cst_16 = arith.constant dense<0.000000e+00> : vector<8x512xf32>
    %58 = tpu.matmul %56, %57, %cst_16 {dimension_numbers = #tpu.dot_dimension_numbers<[1], [0], [0], [1], [0, 0, 1, 1], [], []>} : vector<8x8xbf16>, vector<8x512xbf16>, vector<8x512xf32> -> vector<8x512xf32>
    %59 = arith.addf %49, %58 : vector<8x512xf32>
    %c16_i32_17 = arith.constant 16 : i32
    %60 = tpu.dynamic_rotate %1 by %c16_i32_17 dim 1 : vector<8x512xf32>, i32 -> vector<8x512xf32>
    %cst_18 = arith.constant 0.000000e+00 : f32
    %61 = vector.shape_cast %36 : vector<1x512xi1> to vector<1x512xi1>
    %62 = vector.broadcast %61 : vector<1x512xi1> to vector<8x512xi1>
    %63 = vector.broadcast %cst_18 : f32 to vector<8x512xf32>
    %64 = arith.select %62, %60, %63 : vector<8x512xi1>, vector<8x512xf32>
    %c1 = arith.constant 1 : index
    %c0_19 = arith.constant 0 : index
    %c0_20 = arith.constant 0 : index
    %65 = vector.load %arg2[%c1, %c0_19, %c0_20] : memref<9x8x8xbf16, #tpu.memory_space<vmem>>, vector<1x8x8xbf16>
    %66 = vector.shape_cast %65 : vector<1x8x8xbf16> to vector<8x8xbf16>
    %67 = arith.truncf %64 : vector<8x512xf32> to vector<8x512xbf16>
    %cst_21 = arith.constant dense<0.000000e+00> : vector<8x512xf32>
    %68 = tpu.matmul %66, %67, %cst_21 {dimension_numbers = #tpu.dot_dimension_numbers<[1], [0], [0], [1], [0, 0, 1, 1], [], []>} : vector<8x8xbf16>, vector<8x512xbf16>, vector<8x512xf32> -> vector<8x512xf32>
    %69 = arith.addf %59, %68 : vector<8x512xf32>
    %c15_i32_22 = arith.constant 15 : i32
    %70 = tpu.dynamic_rotate %1 by %c15_i32_22 dim 1 : vector<8x512xf32>, i32 -> vector<8x512xf32>
    %cst_23 = arith.constant 0.000000e+00 : f32
    %71 = vector.shape_cast %44 : vector<1x512xi1> to vector<1x512xi1>
    %72 = vector.broadcast %71 : vector<1x512xi1> to vector<8x512xi1>
    %73 = vector.broadcast %cst_23 : f32 to vector<8x512xf32>
    %74 = arith.select %72, %70, %73 : vector<8x512xi1>, vector<8x512xf32>
    %c2 = arith.constant 2 : index
    %c0_24 = arith.constant 0 : index
    %c0_25 = arith.constant 0 : index
    %75 = vector.load %arg2[%c2, %c0_24, %c0_25] : memref<9x8x8xbf16, #tpu.memory_space<vmem>>, vector<1x8x8xbf16>
    %76 = vector.shape_cast %75 : vector<1x8x8xbf16> to vector<8x8xbf16>
    %77 = arith.truncf %74 : vector<8x512xf32> to vector<8x512xbf16>
    %cst_26 = arith.constant dense<0.000000e+00> : vector<8x512xf32>
    %78 = tpu.matmul %76, %77, %cst_26 {dimension_numbers = #tpu.dot_dimension_numbers<[1], [0], [0], [1], [0, 0, 1, 1], [], []>} : vector<8x8xbf16>, vector<8x512xbf16>, vector<8x512xf32> -> vector<8x512xf32>
    %79 = arith.addf %69, %78 : vector<8x512xf32>
    %c1_i32_27 = arith.constant 1 : i32
    %80 = tpu.dynamic_rotate %1 by %c1_i32_27 dim 1 : vector<8x512xf32>, i32 -> vector<8x512xf32>
    %cst_28 = arith.constant 0.000000e+00 : f32
    %81 = vector.shape_cast %40 : vector<1x512xi1> to vector<1x512xi1>
    %82 = vector.broadcast %81 : vector<1x512xi1> to vector<8x512xi1>
    %83 = vector.broadcast %cst_28 : f32 to vector<8x512xf32>
    %84 = arith.select %82, %80, %83 : vector<8x512xi1>, vector<8x512xf32>
    %c3 = arith.constant 3 : index
    %c0_29 = arith.constant 0 : index
    %c0_30 = arith.constant 0 : index
    %85 = vector.load %arg2[%c3, %c0_29, %c0_30] : memref<9x8x8xbf16, #tpu.memory_space<vmem>>, vector<1x8x8xbf16>
    %86 = vector.shape_cast %85 : vector<1x8x8xbf16> to vector<8x8xbf16>
    %87 = arith.truncf %84 : vector<8x512xf32> to vector<8x512xbf16>
    %cst_31 = arith.constant dense<0.000000e+00> : vector<8x512xf32>
    %88 = tpu.matmul %86, %87, %cst_31 {dimension_numbers = #tpu.dot_dimension_numbers<[1], [0], [0], [1], [0, 0, 1, 1], [], []>} : vector<8x8xbf16>, vector<8x512xbf16>, vector<8x512xf32> -> vector<8x512xf32>
    %89 = arith.addf %79, %88 : vector<8x512xf32>
    %c4 = arith.constant 4 : index
    %c0_32 = arith.constant 0 : index
    %c0_33 = arith.constant 0 : index
    %90 = vector.load %arg2[%c4, %c0_32, %c0_33] : memref<9x8x8xbf16, #tpu.memory_space<vmem>>, vector<1x8x8xbf16>
    %91 = vector.shape_cast %90 : vector<1x8x8xbf16> to vector<8x8xbf16>
    %92 = arith.truncf %1 : vector<8x512xf32> to vector<8x512xbf16>
    %cst_34 = arith.constant dense<0.000000e+00> : vector<8x512xf32>
    %93 = tpu.matmul %91, %92, %cst_34 {dimension_numbers = #tpu.dot_dimension_numbers<[1], [0], [0], [1], [0, 0, 1, 1], [], []>} : vector<8x8xbf16>, vector<8x512xbf16>, vector<8x512xf32> -> vector<8x512xf32>
    %94 = arith.addf %89, %93 : vector<8x512xf32>
    %c511_i32 = arith.constant 511 : i32
    %95 = tpu.dynamic_rotate %1 by %c511_i32 dim 1 : vector<8x512xf32>, i32 -> vector<8x512xf32>
    %cst_35 = arith.constant 0.000000e+00 : f32
    %96 = vector.shape_cast %42 : vector<1x512xi1> to vector<1x512xi1>
    %97 = vector.broadcast %96 : vector<1x512xi1> to vector<8x512xi1>
    %98 = vector.broadcast %cst_35 : f32 to vector<8x512xf32>
    %99 = arith.select %97, %95, %98 : vector<8x512xi1>, vector<8x512xf32>
    %c5 = arith.constant 5 : index
    %c0_36 = arith.constant 0 : index
    %c0_37 = arith.constant 0 : index
    %100 = vector.load %arg2[%c5, %c0_36, %c0_37] : memref<9x8x8xbf16, #tpu.memory_space<vmem>>, vector<1x8x8xbf16>
    %101 = vector.shape_cast %100 : vector<1x8x8xbf16> to vector<8x8xbf16>
    %102 = arith.truncf %99 : vector<8x512xf32> to vector<8x512xbf16>
    %cst_38 = arith.constant dense<0.000000e+00> : vector<8x512xf32>
    %103 = tpu.matmul %101, %102, %cst_38 {dimension_numbers = #tpu.dot_dimension_numbers<[1], [0], [0], [1], [0, 0, 1, 1], [], []>} : vector<8x8xbf16>, vector<8x512xbf16>, vector<8x512xf32> -> vector<8x512xf32>
    %104 = arith.addf %94, %103 : vector<8x512xf32>
    %c497_i32 = arith.constant 497 : i32
    %105 = tpu.dynamic_rotate %1 by %c497_i32 dim 1 : vector<8x512xf32>, i32 -> vector<8x512xf32>
    %cst_39 = arith.constant 0.000000e+00 : f32
    %106 = vector.shape_cast %45 : vector<1x512xi1> to vector<1x512xi1>
    %107 = vector.broadcast %106 : vector<1x512xi1> to vector<8x512xi1>
    %108 = vector.broadcast %cst_39 : f32 to vector<8x512xf32>
    %109 = arith.select %107, %105, %108 : vector<8x512xi1>, vector<8x512xf32>
    %c6 = arith.constant 6 : index
    %c0_40 = arith.constant 0 : index
    %c0_41 = arith.constant 0 : index
    %110 = vector.load %arg2[%c6, %c0_40, %c0_41] : memref<9x8x8xbf16, #tpu.memory_space<vmem>>, vector<1x8x8xbf16>
    %111 = vector.shape_cast %110 : vector<1x8x8xbf16> to vector<8x8xbf16>
    %112 = arith.truncf %109 : vector<8x512xf32> to vector<8x512xbf16>
    %cst_42 = arith.constant dense<0.000000e+00> : vector<8x512xf32>
    %113 = tpu.matmul %111, %112, %cst_42 {dimension_numbers = #tpu.dot_dimension_numbers<[1], [0], [0], [1], [0, 0, 1, 1], [], []>} : vector<8x8xbf16>, vector<8x512xbf16>, vector<8x512xf32> -> vector<8x512xf32>
    %114 = arith.addf %104, %113 : vector<8x512xf32>
    %c496_i32 = arith.constant 496 : i32
    %115 = tpu.dynamic_rotate %1 by %c496_i32 dim 1 : vector<8x512xf32>, i32 -> vector<8x512xf32>
    %cst_43 = arith.constant 0.000000e+00 : f32
    %116 = vector.shape_cast %38 : vector<1x512xi1> to vector<1x512xi1>
    %117 = vector.broadcast %116 : vector<1x512xi1> to vector<8x512xi1>
    %118 = vector.broadcast %cst_43 : f32 to vector<8x512xf32>
    %119 = arith.select %117, %115, %118 : vector<8x512xi1>, vector<8x512xf32>
    %c7 = arith.constant 7 : index
    %c0_44 = arith.constant 0 : index
    %c0_45 = arith.constant 0 : index
    %120 = vector.load %arg2[%c7, %c0_44, %c0_45] : memref<9x8x8xbf16, #tpu.memory_space<vmem>>, vector<1x8x8xbf16>
    %121 = vector.shape_cast %120 : vector<1x8x8xbf16> to vector<8x8xbf16>
    %122 = arith.truncf %119 : vector<8x512xf32> to vector<8x512xbf16>
    %cst_46 = arith.constant dense<0.000000e+00> : vector<8x512xf32>
    %123 = tpu.matmul %121, %122, %cst_46 {dimension_numbers = #tpu.dot_dimension_numbers<[1], [0], [0], [1], [0, 0, 1, 1], [], []>} : vector<8x8xbf16>, vector<8x512xbf16>, vector<8x512xf32> -> vector<8x512xf32>
    %124 = arith.addf %114, %123 : vector<8x512xf32>
    %c495_i32 = arith.constant 495 : i32
    %125 = tpu.dynamic_rotate %1 by %c495_i32 dim 1 : vector<8x512xf32>, i32 -> vector<8x512xf32>
    %cst_47 = arith.constant 0.000000e+00 : f32
    %126 = vector.shape_cast %46 : vector<1x512xi1> to vector<1x512xi1>
    %127 = vector.broadcast %126 : vector<1x512xi1> to vector<8x512xi1>
    %128 = vector.broadcast %cst_47 : f32 to vector<8x512xf32>
    %129 = arith.select %127, %125, %128 : vector<8x512xi1>, vector<8x512xf32>
    %c8 = arith.constant 8 : index
    %c0_48 = arith.constant 0 : index
    %c0_49 = arith.constant 0 : index
    %130 = vector.load %arg2[%c8, %c0_48, %c0_49] : memref<9x8x8xbf16, #tpu.memory_space<vmem>>, vector<1x8x8xbf16>
    %131 = vector.shape_cast %130 : vector<1x8x8xbf16> to vector<8x8xbf16>
    %132 = arith.truncf %129 : vector<8x512xf32> to vector<8x512xbf16>
    %cst_50 = arith.constant dense<0.000000e+00> : vector<8x512xf32>
    %133 = tpu.matmul %131, %132, %cst_50 {dimension_numbers = #tpu.dot_dimension_numbers<[1], [0], [0], [1], [0, 0, 1, 1], [], []>} : vector<8x8xbf16>, vector<8x512xbf16>, vector<8x512xf32> -> vector<8x512xf32>
    %134 = arith.addf %124, %133 : vector<8x512xf32>
    %cst_51 = arith.constant 0.000000e+00 : f32
    %135 = vector.broadcast %cst_51 : f32 to vector<8x512xf32>
    %136 = arith.maximumf %134, %135 : vector<8x512xf32>
    %c0_52 = arith.constant 0 : index
    %c0_53 = arith.constant 0 : index
    %137 = vector.load %arg5[%c0_52, %c0_53] : memref<8x1xf32, #tpu.memory_space<vmem>>, vector<8x1xf32>
    %138 = vector.shape_cast %137 : vector<8x1xf32> to vector<8x1xf32>
    %139 = vector.broadcast %138 : vector<8x1xf32> to vector<8x512xf32>
    %c17_i32_54 = arith.constant 17 : i32
    %140 = tpu.dynamic_rotate %136 by %c17_i32_54 dim 1 : vector<8x512xf32>, i32 -> vector<8x512xf32>
    %cst_55 = arith.constant 0.000000e+00 : f32
    %141 = vector.shape_cast %43 : vector<1x512xi1> to vector<1x512xi1>
    %142 = vector.broadcast %141 : vector<1x512xi1> to vector<8x512xi1>
    %143 = vector.broadcast %cst_55 : f32 to vector<8x512xf32>
    %144 = arith.select %142, %140, %143 : vector<8x512xi1>, vector<8x512xf32>
    %c0_56 = arith.constant 0 : index
    %c0_57 = arith.constant 0 : index
    %c0_58 = arith.constant 0 : index
    %145 = vector.load %arg4[%c0_56, %c0_57, %c0_58] : memref<9x8x8xbf16, #tpu.memory_space<vmem>>, vector<1x8x8xbf16>
    %146 = vector.shape_cast %145 : vector<1x8x8xbf16> to vector<8x8xbf16>
    %147 = arith.truncf %144 : vector<8x512xf32> to vector<8x512xbf16>
    %cst_59 = arith.constant dense<0.000000e+00> : vector<8x512xf32>
    %148 = tpu.matmul %146, %147, %cst_59 {dimension_numbers = #tpu.dot_dimension_numbers<[1], [0], [0], [1], [0, 0, 1, 1], [], []>} : vector<8x8xbf16>, vector<8x512xbf16>, vector<8x512xf32> -> vector<8x512xf32>
    %149 = arith.addf %139, %148 : vector<8x512xf32>
    %c16_i32_60 = arith.constant 16 : i32
    %150 = tpu.dynamic_rotate %136 by %c16_i32_60 dim 1 : vector<8x512xf32>, i32 -> vector<8x512xf32>
    %cst_61 = arith.constant 0.000000e+00 : f32
    %151 = vector.shape_cast %36 : vector<1x512xi1> to vector<1x512xi1>
    %152 = vector.broadcast %151 : vector<1x512xi1> to vector<8x512xi1>
    %153 = vector.broadcast %cst_61 : f32 to vector<8x512xf32>
    %154 = arith.select %152, %150, %153 : vector<8x512xi1>, vector<8x512xf32>
    %c1_62 = arith.constant 1 : index
    %c0_63 = arith.constant 0 : index
    %c0_64 = arith.constant 0 : index
    %155 = vector.load %arg4[%c1_62, %c0_63, %c0_64] : memref<9x8x8xbf16, #tpu.memory_space<vmem>>, vector<1x8x8xbf16>
    %156 = vector.shape_cast %155 : vector<1x8x8xbf16> to vector<8x8xbf16>
    %157 = arith.truncf %154 : vector<8x512xf32> to vector<8x512xbf16>
    %cst_65 = arith.constant dense<0.000000e+00> : vector<8x512xf32>
    %158 = tpu.matmul %156, %157, %cst_65 {dimension_numbers = #tpu.dot_dimension_numbers<[1], [0], [0], [1], [0, 0, 1, 1], [], []>} : vector<8x8xbf16>, vector<8x512xbf16>, vector<8x512xf32> -> vector<8x512xf32>
    %159 = arith.addf %149, %158 : vector<8x512xf32>
    %c15_i32_66 = arith.constant 15 : i32
    %160 = tpu.dynamic_rotate %136 by %c15_i32_66 dim 1 : vector<8x512xf32>, i32 -> vector<8x512xf32>
    %cst_67 = arith.constant 0.000000e+00 : f32
    %161 = vector.shape_cast %44 : vector<1x512xi1> to vector<1x512xi1>
    %162 = vector.broadcast %161 : vector<1x512xi1> to vector<8x512xi1>
    %163 = vector.broadcast %cst_67 : f32 to vector<8x512xf32>
    %164 = arith.select %162, %160, %163 : vector<8x512xi1>, vector<8x512xf32>
    %c2_68 = arith.constant 2 : index
    %c0_69 = arith.constant 0 : index
    %c0_70 = arith.constant 0 : index
    %165 = vector.load %arg4[%c2_68, %c0_69, %c0_70] : memref<9x8x8xbf16, #tpu.memory_space<vmem>>, vector<1x8x8xbf16>
    %166 = vector.shape_cast %165 : vector<1x8x8xbf16> to vector<8x8xbf16>
    %167 = arith.truncf %164 : vector<8x512xf32> to vector<8x512xbf16>
    %cst_71 = arith.constant dense<0.000000e+00> : vector<8x512xf32>
    %168 = tpu.matmul %166, %167, %cst_71 {dimension_numbers = #tpu.dot_dimension_numbers<[1], [0], [0], [1], [0, 0, 1, 1], [], []>} : vector<8x8xbf16>, vector<8x512xbf16>, vector<8x512xf32> -> vector<8x512xf32>
    %169 = arith.addf %159, %168 : vector<8x512xf32>
    %c1_i32_72 = arith.constant 1 : i32
    %170 = tpu.dynamic_rotate %136 by %c1_i32_72 dim 1 : vector<8x512xf32>, i32 -> vector<8x512xf32>
    %cst_73 = arith.constant 0.000000e+00 : f32
    %171 = vector.shape_cast %40 : vector<1x512xi1> to vector<1x512xi1>
    %172 = vector.broadcast %171 : vector<1x512xi1> to vector<8x512xi1>
    %173 = vector.broadcast %cst_73 : f32 to vector<8x512xf32>
    %174 = arith.select %172, %170, %173 : vector<8x512xi1>, vector<8x512xf32>
    %c3_74 = arith.constant 3 : index
    %c0_75 = arith.constant 0 : index
    %c0_76 = arith.constant 0 : index
    %175 = vector.load %arg4[%c3_74, %c0_75, %c0_76] : memref<9x8x8xbf16, #tpu.memory_space<vmem>>, vector<1x8x8xbf16>
    %176 = vector.shape_cast %175 : vector<1x8x8xbf16> to vector<8x8xbf16>
    %177 = arith.truncf %174 : vector<8x512xf32> to vector<8x512xbf16>
    %cst_77 = arith.constant dense<0.000000e+00> : vector<8x512xf32>
    %178 = tpu.matmul %176, %177, %cst_77 {dimension_numbers = #tpu.dot_dimension_numbers<[1], [0], [0], [1], [0, 0, 1, 1], [], []>} : vector<8x8xbf16>, vector<8x512xbf16>, vector<8x512xf32> -> vector<8x512xf32>
    %179 = arith.addf %169, %178 : vector<8x512xf32>
    %c4_78 = arith.constant 4 : index
    %c0_79 = arith.constant 0 : index
    %c0_80 = arith.constant 0 : index
    %180 = vector.load %arg4[%c4_78, %c0_79, %c0_80] : memref<9x8x8xbf16, #tpu.memory_space<vmem>>, vector<1x8x8xbf16>
    %181 = vector.shape_cast %180 : vector<1x8x8xbf16> to vector<8x8xbf16>
    %182 = arith.truncf %136 : vector<8x512xf32> to vector<8x512xbf16>
    %cst_81 = arith.constant dense<0.000000e+00> : vector<8x512xf32>
    %183 = tpu.matmul %181, %182, %cst_81 {dimension_numbers = #tpu.dot_dimension_numbers<[1], [0], [0], [1], [0, 0, 1, 1], [], []>} : vector<8x8xbf16>, vector<8x512xbf16>, vector<8x512xf32> -> vector<8x512xf32>
    %184 = arith.addf %179, %183 : vector<8x512xf32>
    %c511_i32_82 = arith.constant 511 : i32
    %185 = tpu.dynamic_rotate %136 by %c511_i32_82 dim 1 : vector<8x512xf32>, i32 -> vector<8x512xf32>
    %cst_83 = arith.constant 0.000000e+00 : f32
    %186 = vector.shape_cast %42 : vector<1x512xi1> to vector<1x512xi1>
    %187 = vector.broadcast %186 : vector<1x512xi1> to vector<8x512xi1>
    %188 = vector.broadcast %cst_83 : f32 to vector<8x512xf32>
    %189 = arith.select %187, %185, %188 : vector<8x512xi1>, vector<8x512xf32>
    %c5_84 = arith.constant 5 : index
    %c0_85 = arith.constant 0 : index
    %c0_86 = arith.constant 0 : index
    %190 = vector.load %arg4[%c5_84, %c0_85, %c0_86] : memref<9x8x8xbf16, #tpu.memory_space<vmem>>, vector<1x8x8xbf16>
    %191 = vector.shape_cast %190 : vector<1x8x8xbf16> to vector<8x8xbf16>
    %192 = arith.truncf %189 : vector<8x512xf32> to vector<8x512xbf16>
    %cst_87 = arith.constant dense<0.000000e+00> : vector<8x512xf32>
    %193 = tpu.matmul %191, %192, %cst_87 {dimension_numbers = #tpu.dot_dimension_numbers<[1], [0], [0], [1], [0, 0, 1, 1], [], []>} : vector<8x8xbf16>, vector<8x512xbf16>, vector<8x512xf32> -> vector<8x512xf32>
    %194 = arith.addf %184, %193 : vector<8x512xf32>
    %c497_i32_88 = arith.constant 497 : i32
    %195 = tpu.dynamic_rotate %136 by %c497_i32_88 dim 1 : vector<8x512xf32>, i32 -> vector<8x512xf32>
    %cst_89 = arith.constant 0.000000e+00 : f32
    %196 = vector.shape_cast %45 : vector<1x512xi1> to vector<1x512xi1>
    %197 = vector.broadcast %196 : vector<1x512xi1> to vector<8x512xi1>
    %198 = vector.broadcast %cst_89 : f32 to vector<8x512xf32>
    %199 = arith.select %197, %195, %198 : vector<8x512xi1>, vector<8x512xf32>
    %c6_90 = arith.constant 6 : index
    %c0_91 = arith.constant 0 : index
    %c0_92 = arith.constant 0 : index
    %200 = vector.load %arg4[%c6_90, %c0_91, %c0_92] : memref<9x8x8xbf16, #tpu.memory_space<vmem>>, vector<1x8x8xbf16>
    %201 = vector.shape_cast %200 : vector<1x8x8xbf16> to vector<8x8xbf16>
    %202 = arith.truncf %199 : vector<8x512xf32> to vector<8x512xbf16>
    %cst_93 = arith.constant dense<0.000000e+00> : vector<8x512xf32>
    %203 = tpu.matmul %201, %202, %cst_93 {dimension_numbers = #tpu.dot_dimension_numbers<[1], [0], [0], [1], [0, 0, 1, 1], [], []>} : vector<8x8xbf16>, vector<8x512xbf16>, vector<8x512xf32> -> vector<8x512xf32>
    %204 = arith.addf %194, %203 : vector<8x512xf32>
    %c496_i32_94 = arith.constant 496 : i32
    %205 = tpu.dynamic_rotate %136 by %c496_i32_94 dim 1 : vector<8x512xf32>, i32 -> vector<8x512xf32>
    %cst_95 = arith.constant 0.000000e+00 : f32
    %206 = vector.shape_cast %38 : vector<1x512xi1> to vector<1x512xi1>
    %207 = vector.broadcast %206 : vector<1x512xi1> to vector<8x512xi1>
    %208 = vector.broadcast %cst_95 : f32 to vector<8x512xf32>
    %209 = arith.select %207, %205, %208 : vector<8x512xi1>, vector<8x512xf32>
    %c7_96 = arith.constant 7 : index
    %c0_97 = arith.constant 0 : index
    %c0_98 = arith.constant 0 : index
    %210 = vector.load %arg4[%c7_96, %c0_97, %c0_98] : memref<9x8x8xbf16, #tpu.memory_space<vmem>>, vector<1x8x8xbf16>
    %211 = vector.shape_cast %210 : vector<1x8x8xbf16> to vector<8x8xbf16>
    %212 = arith.truncf %209 : vector<8x512xf32> to vector<8x512xbf16>
    %cst_99 = arith.constant dense<0.000000e+00> : vector<8x512xf32>
    %213 = tpu.matmul %211, %212, %cst_99 {dimension_numbers = #tpu.dot_dimension_numbers<[1], [0], [0], [1], [0, 0, 1, 1], [], []>} : vector<8x8xbf16>, vector<8x512xbf16>, vector<8x512xf32> -> vector<8x512xf32>
    %214 = arith.addf %204, %213 : vector<8x512xf32>
    %c495_i32_100 = arith.constant 495 : i32
    %215 = tpu.dynamic_rotate %136 by %c495_i32_100 dim 1 : vector<8x512xf32>, i32 -> vector<8x512xf32>
    %cst_101 = arith.constant 0.000000e+00 : f32
    %216 = vector.shape_cast %46 : vector<1x512xi1> to vector<1x512xi1>
    %217 = vector.broadcast %216 : vector<1x512xi1> to vector<8x512xi1>
    %218 = vector.broadcast %cst_101 : f32 to vector<8x512xf32>
    %219 = arith.select %217, %215, %218 : vector<8x512xi1>, vector<8x512xf32>
    %c8_102 = arith.constant 8 : index
    %c0_103 = arith.constant 0 : index
    %c0_104 = arith.constant 0 : index
    %220 = vector.load %arg4[%c8_102, %c0_103, %c0_104] : memref<9x8x8xbf16, #tpu.memory_space<vmem>>, vector<1x8x8xbf16>
    %221 = vector.shape_cast %220 : vector<1x8x8xbf16> to vector<8x8xbf16>
    %222 = arith.truncf %219 : vector<8x512xf32> to vector<8x512xbf16>
    %cst_105 = arith.constant dense<0.000000e+00> : vector<8x512xf32>
    %223 = tpu.matmul %221, %222, %cst_105 {dimension_numbers = #tpu.dot_dimension_numbers<[1], [0], [0], [1], [0, 0, 1, 1], [], []>} : vector<8x8xbf16>, vector<8x512xbf16>, vector<8x512xf32> -> vector<8x512xf32>
    %224 = arith.addf %214, %223 : vector<8x512xf32>
    %225 = arith.addf %224, %1 : vector<8x512xf32>
    %cst_106 = arith.constant 0.000000e+00 : f32
    %226 = vector.broadcast %cst_106 : f32 to vector<8x512xf32>
    %227 = arith.maximumf %225, %226 : vector<8x512xf32>
    %c0_107 = arith.constant 0 : index
    %c0_108 = arith.constant 0 : index
    %228 = vector.load %arg6[%c0_107, %c0_108] : memref<8x512xf32, #tpu.memory_space<vmem>>, vector<8x512xf32>
    tpu.vector_store %arg6[%c0_107, %c0_108], %227 {strides = array<i32>} : memref<8x512xf32, #tpu.memory_space<vmem>>, vector<8x512xf32>,
    return
  }
  func.func @transform_0(%arg0: i32) -> (i32, i32) {
    %c0_i32 = arith.constant 0 : i32
    %c0_i32_0 = arith.constant 0 : i32
    return %c0_i32, %arg0 : i32, i32
  }
  func.func @transform_1(%arg0: i32) -> (i32, i32, i32) {
    %c0_i32 = arith.constant 0 : i32
    %c0_i32_0 = arith.constant 0 : i32
    %c0_i32_1 = arith.constant 0 : i32
    %c0_i32_2 = arith.constant 0 : i32
    return %c0_i32, %c0_i32_0, %c0_i32_1 : i32, i32, i32
  }
  func.func @transform_2(%arg0: i32) -> (i32, i32) {
    %c0_i32 = arith.constant 0 : i32
    %c0_i32_0 = arith.constant 0 : i32
    %c0_i32_1 = arith.constant 0 : i32
    return %c0_i32, %c0_i32_0 : i32, i32
  }
  func.func @transform_3(%arg0: i32) -> (i32, i32, i32) {
    %c0_i32 = arith.constant 0 : i32
    %c0_i32_0 = arith.constant 0 : i32
    %c0_i32_1 = arith.constant 0 : i32
    %c0_i32_2 = arith.constant 0 : i32
    return %c0_i32, %c0_i32_0, %c0_i32_1 : i32, i32, i32
  }
  func.func @transform_4(%arg0: i32) -> (i32, i32) {
    %c0_i32 = arith.constant 0 : i32
    %c0_i32_0 = arith.constant 0 : i32
    %c0_i32_1 = arith.constant 0 : i32
    return %c0_i32, %c0_i32_0 : i32, i32
  }
  func.func @transform_5(%arg0: i32) -> (i32, i32) {
    %c0_i32 = arith.constant 0 : i32
    %c0_i32_0 = arith.constant 0 : i32
    return %c0_i32, %arg0 : i32, i32
  }
}

</mosaic_0001>

<bundles_post_ra>
// kernel: tpu_custom_call.1
= control target key start
LH: loop header
LB: loop body
LE: loop exit
PB: predicated region body
PF: predicated region fallthrough
CT: control target
= control target key end

     0   :  { %s3533_s0 = inlined_call_operand.vmem [shape: bf16[8,512], index: 0, kind: input, shape index: {}]   ;;  %s3534_s1 = inlined_call_operand.vmem [shape: bf16[9,8,8], index: 1, kind: input, shape index: {}]   ;;  %s3535_s2 = inlined_call_operand.vmem [shape: f32[8,1], index: 2, kind: input, shape index: {}]   ;;  %s3536_s3 = inlined_call_operand.vmem [shape: bf16[9,8,8], index: 3, kind: input, shape index: {}]   ;;  %s3537_s4 = inlined_call_operand.vmem [shape: f32[8,1], index: 4, kind: input, shape index: {}]   ;;  %s3538_s5 = inlined_call_operand.hbm [shape: f32[8,512], index: 5, kind: output, shape index: {}]  }
   0x1   :  { %v2865_v0 = vld [vmem:[%s3533_s0] sm:$0xff]  ;;  %v2870_v1 = vld [vmem:[%s3533_s0 + $0x8] sm:$0xff] }
   0x2   :  { %v24_v2 = vunpack.c.l.bf16 %v2865_v0  ;;  %v25_v3 = vunpack.c.h.bf16 %v2865_v0  ;;  %v26_v4 = vunpack.c.l.bf16 %v2870_v1  ;;  %v27_v5 = vunpack.c.h.bf16 %v2870_v1 }
   0x3   :  { %10 = vsyncpa [#allocation3], 0  ;;  %s2822_s22 = smov 17   ;;  %s2823_s23 = smov 16   ;;  %v2824_v8 = vmov 0   ;;  %v28_v9 = vlaneseq  ;;  %v161_v11 = vld [vmem:[%s3535_s2] sm:$0xff] }
   0x4   :  { %v2633_v6 = vpack.i.bf16 %v25_v3, %v24_v2  ;;  %v2638_v7 = vpack.i.bf16 %v27_v5, %v26_v4  ;;  %246 = vmatprep.mubr.bf16.mxu0 %v2824_v8  ;;  %287 = vmatprep.mubr.bf16.mxu1 %v2824_v8  ;;  %s2825_s0 = smov 15   ;;  %s2826_s24 = smov 1   ;;  %vm3554_vm3 = vcmask 1043456   ;;  %vm3553_vm9 = vcmask 64512  }
   0x5   :  { %2713 = vset.pattern.permute.xlu0 %v2824_v8  ;;  %s2827_s25 = smov 127   ;;  %s2828_s26 = smov 113   ;;  %v2903_v10 = vand.u32 127, %v28_v9 }
   0x6   :  { %2634 = vrot.lane.b32.xlu0 %v2633_v6, %s2822_s22  ;;  %2644 = vrot.lane.b32.xlu1 %v2633_v6, %s2823_s23  ;;  %s2829_s27 = smov 112   ;;  %s2830_s28 = smov 111  }
   0x7   :  { %v2909_v12 = vadd.s32 128, %v2903_v10  ;;  %v31_v13 = vadd.s32 256, %v2903_v10  ;;  %v2914_v15 = vadd.s32 384, %v2903_v10  ;;  %v37_v16 = vand.u32 255, %v2903_v10 }
   0x8   :  { %vm3539_vm0 = vcmp.lt.s32.totalorder %v2903_v10, 16  ;;  %vm3540_vm2 = vcmp.lt.s32.totalorder %v2903_v10, 17  ;;  %vm3544_vm10 = vcmp.lt.s32.totalorder %v2903_v10, 15 }
   0x9   :  { %v44_v14 = vand.u32 255, %v2909_v12  ;;  %v51_v17 = vand.u32 255, %v31_v13  ;;  %v58_v19 = vand.u32 255, %v2914_v15  ;;  %v2922_v20 = vand.u32 15, %v37_v16 }
   0xa   :  { %2639 = vrot.lane.b32.xlu0 %v2638_v7, %s2822_s22  ;;  %2649 = vrot.lane.b32.xlu1 %v2638_v7, %s2823_s23  ;;  %vm2933_vm4 = vcmp.ge.s32.totalorder %v37_v16, 16 }
   0xb   :  { %v2919_v18 = vand.u32 15, %v44_v14  ;;  %v2924_v21 = vand.u32 15, %v51_v17  ;;  %v2931_v24 = vand.u32 15, %v58_v19  ;;  %vm3548_vm5 = vcmp.ne.s32.totalorder %v2922_v20, 0 }
   0xc   :  { %vm2942_vm6 = vcmp.ge.s32.totalorder %v51_v17, 16  ;;  %vm2955_vm11 = vmand %vm2933_vm4, %vm3548_vm5  ;;  %vm3542_vm15 = vcmp.ne.s32.totalorder %v2922_v20, 15 }
   0xd   :  { %vm3550_vm1 = vcmp.ne.s32.totalorder %v2919_v18, 0  ;;  %vm3547_vm7 = vcmp.ne.s32.totalorder %v2924_v21, 0  ;;  %vm3549_vm8 = vcmp.ne.s32.totalorder %v2931_v24, 0  ;;  %vm3545_vm12 = vcmp.ne.s32.totalorder %v2919_v18, 15 }
   0xe   :  { %2659 = vrot.lane.b32.xlu1 %v2638_v7, %s2825_s0  ;;  %2654 = vrot.lane.b32.xlu0 %v2633_v6, %s2825_s0  ;;  %vm3541_vm13 = vcmp.ne.s32.totalorder %v2931_v24, 15  ;;  %vm2965_vm14 = vmand %vm2942_vm6, %vm3547_vm7 }
  0x12   :  { %2669 = vrot.lane.b32.xlu1 %v2638_v7, %s2826_s24  ;;  %2664 = vrot.lane.b32.xlu0 %v2633_v6, %s2826_s24 }
  0x16   :  { %2679 = vrot.lane.b32.xlu1 %v2638_v7, %s2827_s25  ;;  %2674 = vrot.lane.b32.xlu0 %v2633_v6, %s2827_s25 }
  0x1a   :  { %2689 = vrot.lane.b32.xlu1 %v2638_v7, %s2828_s26  ;;  %2684 = vrot.lane.b32.xlu0 %v2633_v6, %s2828_s26 }
  0x1e   :  { %2699 = vrot.lane.b32.xlu1 %v2638_v7, %s2829_s27  ;;  %2694 = vrot.lane.b32.xlu0 %v2633_v6, %s2829_s27 }
  0x22   :  { %2709 = vrot.lane.b32.xlu1 %v2638_v7, %s2830_s28  ;;  %2704 = vrot.lane.b32.xlu0 %v2633_v6, %s2830_s28 }
  0x26   :  { %164 = vperm.xlu0 %2713, %v161_v11   ;;  %v192_v11 = vld [vmem:[%s3534_s1] sm:$0xf] }
  0x78   :  { %v2635_v22 = vpop.permute.xlu0 %2634  ;;  %v2645_v23 = vpop.permute.xlu1 %2644 }
  0x79   :  { %v2637_v25 = vunpack.i.h.bf16 %v2635_v22  ;;  %v2636_v26 = vunpack.i.l.bf16 %v2635_v22  ;;  %v2647_v27 = vunpack.i.h.bf16 %v2645_v23  ;;  %v2646_v28 = vunpack.i.l.bf16 %v2645_v23 }
  0x7b   :  { %v311_v30 = vsel %vm3539_vm0, %v2646_v28, %v2647_v27  ;;  %v178_v31 = vsel %vm3540_vm2, %v2636_v26, %v2637_v25 }
  0x7c   :  { %v2640_v33 = vpop.permute.xlu0 %2639  ;;  %v189_v34 = vsel %vm3550_vm1, %v178_v31, 0.0  ;;  %v2650_v35 = vpop.permute.xlu1 %2649  ;;  %v328_v41 = vpack.c.bf16 %v311_v30, %v311_v30 }
  0x7d   :  { %v2642_v36 = vunpack.i.h.bf16 %v2640_v33  ;;  %v2641_v37 = vunpack.i.l.bf16 %v2640_v33  ;;  %v194_v38 = vpack.c.bf16 %v189_v34, %v189_v34  ;;  %v2652_v39 = vunpack.i.h.bf16 %v2650_v35 }
  0x7e   :  { %v2651_v42 = vunpack.i.l.bf16 %v2650_v35 }
  0x7f   :  { %2463 = vmatprep.subr.msk.bf16.mxu0 %vm3554_vm3, %v194_v38  ;;  %v312_v44 = vsel %vm3539_vm0, %v2652_v39, %v2646_v28  ;;  %v176_v45 = vsel %vm3540_vm2, %v2641_v37, %v2642_v36  ;;  %v179_v46 = vsel %vm3540_vm2, %v2642_v36, %v2636_v26  ;;  %v177_v47 = vsel %vm3540_vm2, %v2637_v25, %v2641_v37  ;;  %vm3019_vm2 = vmand %vm2933_vm4, %vm3542_vm15 }
  0x80   :  { %v309_v48 = vsel %vm3539_vm0, %v2651_v42, %v2652_v39  ;;  %v310_v49 = vsel %vm3539_vm0, %v2647_v27, %v2651_v42  ;;  %v191_v50 = vsel %vm3549_vm8, %v176_v45, 0.0  ;;  %v188_v51 = vsel %vm2955_vm11, %v179_v46, 0.0  ;;  %v2660_v52 = vpop.permute.xlu1 %2659  ;;  %v2655_v57 = vpop.permute.xlu0 %2654 }
  0x81   :  { %v330_v53 = vpack.c.bf16 %v309_v48, %v309_v48  ;;  %v196_v54 = vpack.c.bf16 %v191_v50, %v191_v50  ;;  %v193_v55 = vpack.c.bf16 %v188_v51, %v188_v51  ;;  %v190_v56 = vsel %vm2965_vm14, %v177_v47, 0.0  ;;  %v2467_v51 = vld [vmem:[%s3534_s1 + $0x4] sm:$0xf] }
  0x82   :  { %v195_v58 = vpack.c.bf16 %v190_v56, %v190_v56  ;;  %v321_v59 = vsel %vm2933_vm4, %v312_v44, 0.0  ;;  %v323_v60 = vsel %vm2942_vm6, %v310_v49, 0.0  ;;  %v2662_v61 = vunpack.i.h.bf16 %v2660_v52 }
  0x83   :  { %2465 = vmatprep.subr.msk.bf16.mxu1 %vm3554_vm3, %v196_v54  ;;  %v203_v62 = vsel %vm3554_vm3, %v193_v55, 0  ;;  %v327_v63 = vpack.c.bf16 %v321_v59, %v321_v59  ;;  %v329_v6 = vpack.c.bf16 %v323_v60, %v323_v60  ;;  %v2661_v7 = vunpack.i.l.bf16 %v2660_v52 }
  0x84   :  { %215 = vmatpush1.bf16.msra.mxu0 %v203_v62  ;;  %v209_v9 = vsel %vm3554_vm3, %v195_v58, 0  ;;  %v2657_v13 = vunpack.i.h.bf16 %v2655_v57  ;;  %v2656_v16 = vunpack.i.l.bf16 %v2655_v57  ;;  %vm3552_vm0 = vcmp.ne.s32.totalorder %v2924_v21, 15  ;;  %v2670_v27 = vpop.permute.xlu1 %2669  ;;  %v2665_v28 = vpop.permute.xlu0 %2664 }
  0x85   :  { %256 = vmatpush1.bf16.msra.mxu1 %v209_v9  ;;  %2468 = vmatprep.subr.msk.bf16.mxu0 %vm3554_vm3, %v328_v41  ;;  %v335_v17 = vsel %vm3554_vm3, %v327_v63, 0  ;;  %v441_v22 = vsel %vm3544_vm10, %v2661_v7, %v2662_v61  ;;  %v341_v23 = vsel %vm3554_vm3, %v329_v6, 0  ;;  %vm3543_vm15 = vcmp.lt.s32.totalorder %v2903_v10, 1  ;;  %v2472_v63 = vld [vmem:[%s3534_s1 + $0x8] sm:$0xf] }
  0x86   :  { %2470 = vmatprep.subr.msk.bf16.mxu1 %vm3554_vm3, %v330_v53  ;;  %v456_v25 = vsel %vm3541_vm13, %v441_v22, 0.0  ;;  %v443_v26 = vsel %vm3544_vm10, %v2656_v16, %v2657_v13  ;;  %v444_v30 = vsel %vm3544_vm10, %v2662_v61, %v2656_v16  ;;  %v442_v35 = vsel %vm3544_vm10, %v2657_v13, %v2661_v7  ;;  %vm3030_vm13 = vmand %vm2942_vm6, %vm3552_vm0 }
  0x87   :  { %2464 = vmatmul.mubr.msk.bf16.vlgmr.msra.gmra.mrb[0].mxu0 %vm3553_vm9, %v192_v11  ;;  %v454_v31 = vsel %vm3545_vm12, %v443_v26, 0.0  ;;  %v462_v33 = vpack.c.bf16 %v456_v25, %v456_v25  ;;  %v2672_v38 = vunpack.i.h.bf16 %v2670_v27  ;;  %v2671_v39 = vunpack.i.l.bf16 %v2670_v27 }
  0x88   :  { %2466 = vmatmul.mubr.msk.bf16.vlgmr.msra.gmra.mrb[0].mxu1 %vm3553_vm9, %v192_v11  ;;  %347 = vmatpush1.bf16.msra.mxu0 %v335_v17  ;;  %v460_v36 = vpack.c.bf16 %v454_v31, %v454_v31  ;;  %v2667_v41 = vunpack.i.h.bf16 %v2665_v28  ;;  %v2666_v42 = vunpack.i.l.bf16 %v2665_v28  ;;  %v453_v44 = vsel %vm3019_vm2, %v444_v30, 0.0  ;;  %v2680_v7 = vpop.permute.xlu1 %2679  ;;  %v2675_v9 = vpop.permute.xlu0 %2674 }
  0x89   :  { %388 = vmatpush1.bf16.msra.mxu1 %v341_v23  ;;  %378 = vmatprep.mubr.bf16.mxu0 %v2824_v8  ;;  %v455_v45 = vsel %vm3030_vm13, %v442_v35, 0.0  ;;  %v459_v47 = vpack.c.bf16 %v453_v44, %v453_v44  ;;  %v573_v48 = vsel %vm3543_vm15, %v2671_v39, %v2672_v38  ;;  %v2484_v13 = vcombine.high %v2865_v0, %v2865_v0 }
  0x8a   :  { %419 = vmatprep.mubr.bf16.mxu1 %v2824_v8  ;;  %2473 = vmatprep.subr.msk.bf16.mxu0 %vm3554_vm3, %v460_v36  ;;  %v575_v46 = vsel %vm3543_vm15, %v2666_v42, %v2667_v41  ;;  %v461_v49 = vpack.c.bf16 %v455_v45, %v455_v45  ;;  %v588_v52 = vsel %vm3549_vm8, %v573_v48, 0.0  ;;  %v576_v56 = vsel %vm3543_vm15, %v2672_v38, %v2666_v42 }
  0x8b   :  { %2475 = vmatprep.subr.msk.bf16.mxu1 %vm3554_vm3, %v462_v33  ;;  %v586_v50 = vsel %vm3550_vm1, %v575_v46, 0.0  ;;  %v467_v53 = vsel %vm3554_vm3, %v459_v47, 0  ;;  %v594_v57 = vpack.c.bf16 %v588_v52, %v588_v52  ;;  %v574_v58 = vsel %vm3543_vm15, %v2667_v41, %v2671_v39  ;;  %v2477_v33 = vld [vmem:[%s3534_s1 + $0xc] sm:$0xf] }
  0x8c   :  { %v473_v54 = vsel %vm3554_vm3, %v461_v49, 0  ;;  %v592_v55 = vpack.c.bf16 %v586_v50, %v586_v50  ;;  %v585_v59 = vsel %vm3548_vm5, %v576_v56, 0.0  ;;  %v587_v60 = vsel %vm3547_vm7, %v574_v58, 0.0  ;;  %v2690_v38 = vpop.permute.xlu1 %2689  ;;  %v2685_v39 = vpop.permute.xlu0 %2684  ;;  %v2482_v58 = vld [vmem:[%s3534_s1 + $0x10] sm:$0xf] }
  0x8d   :  { %v591_v61 = vpack.c.bf16 %v585_v59, %v585_v59  ;;  %v593_v62 = vpack.c.bf16 %v587_v60, %v587_v60  ;;  %v2486_v16 = vcombine.high %v2870_v1, %v2870_v1  ;;  %v2681_v17 = vunpack.i.l.bf16 %v2680_v7 }
  0x8e   :  { %v2677_v22 = vunpack.i.h.bf16 %v2675_v9  ;;  %vm3546_vm15 = vcmp.lt.s32.totalorder %v2903_v10, 127  ;;  %v2682_v23 = vunpack.i.h.bf16 %v2680_v7  ;;  %v2676_v25 = vunpack.i.l.bf16 %v2675_v9 }
  0x8f   :  { %v599_v6 = vsel %vm3554_vm3, %v591_v61, 0  ;;  %v605_v11 = vsel %vm3554_vm3, %v593_v62, 0  ;;  %v2483_v27 = vcombine.low %v2865_v0, %v2865_v0  ;;  %v2485_v30 = vcombine.low %v2870_v1, %v2870_v1 }
  0x90   :  { %v819_v26 = vsel %vm3546_vm15, %v2677_v22, %v2681_v17  ;;  %v821_v28 = vsel %vm3546_vm15, %v2682_v23, %v2676_v25  ;;  %vm3572_vm10 = vcmp.ne.s32.totalorder %v2931_v24, 15  ;;  %v820_v44 = vsel %vm3546_vm15, %v2676_v25, %v2677_v22  ;;  %v2700_v61 = vpop.permute.xlu1 %2699  ;;  %v2695_v62 = vpop.permute.xlu0 %2694 }
  0x91   :  { %v831_v31 = vsel %vm3545_vm12, %v819_v26, 0.0  ;;  %v833_v35 = vsel %vm3572_vm10, %v821_v28, 0.0  ;;  %v712_v36 = vsel %vm3554_vm3, %v2483_v27, 0  ;;  %v718_v41 = vsel %vm3554_vm3, %v2485_v30, 0 }
  0x92   :  { %v837_v42 = vpack.c.bf16 %v831_v31, %v831_v31  ;;  %v839_v45 = vpack.c.bf16 %v833_v35, %v833_v35  ;;  %v818_v46 = vsel %vm3546_vm15, %v2681_v17, %v2682_v23  ;;  %v2691_v47 = vunpack.i.l.bf16 %v2690_v38 }
  0x93   :  { %2469 = vmatmul.mubr.msk.bf16.vlgmr.msra.gmra.mrb[0].mxu0 %vm3553_vm9, %v2467_v51  ;;  %v2687_v48 = vunpack.i.h.bf16 %v2685_v39  ;;  %vm3551_vm10 = vcmp.lt.s32.totalorder %v2903_v10, 113  ;;  %v2692_v49 = vunpack.i.h.bf16 %v2690_v38  ;;  %vm3113_vm12 = vcmp.lt.s32.totalorder %v44_v14, 240 }
  0x94   :  { %2471 = vmatmul.mubr.msk.bf16.vlgmr.msra.gmra.mrb[0].mxu1 %vm3553_vm9, %v2467_v51  ;;  %479 = vmatpush1.bf16.msra.mxu0 %v467_v53  ;;  %v3573_v50 = vmov 0  ;;  %v2686_v51 = vunpack.i.l.bf16 %v2685_v39  ;;  %vm3575_vm15 = vcmp.ne.s32.totalorder %v2922_v20, 15  ;;  %vm3123_vm7 = vcmp.lt.s32.totalorder %v58_v19, 240  ;;  %vm3134_vm5 = vmand %vm3113_vm12, %vm3550_vm1  ;;  %v2710_v38 = vpop.permute.xlu1 %2709  ;;  %v2705_v39 = vpop.permute.xlu0 %2704 }
  0x95   :  { %520 = vmatpush1.bf16.msra.mxu1 %v473_v54  ;;  %510 = vmatprep.mubr.bf16.mxu0 %v2824_v8  ;;  %v3574_v50 = vsel %vm3113_vm12, 4294967295, %v3573_v50  ;;  %v830_v52 = vsel %vm3575_vm15, %v820_v44, 0.0  ;;  %v832_v12 = vsel %vm3552_vm0, %v818_v46, 0.0  ;;  %v951_v15 = vsel %vm3551_vm10, %v2687_v48, %v2691_v47  ;;  %vm3144_vm15 = vmand %vm3123_vm7, %vm3549_vm8 }
  0x96   :  { %551 = vmatprep.mubr.bf16.mxu1 %v2824_v8  ;;  %2478 = vmatprep.subr.msk.bf16.mxu0 %vm3554_vm3, %v592_v55  ;;  %v836_v19 = vpack.c.bf16 %v830_v52, %v830_v52  ;;  %v953_v55 = vsel %vm3551_vm10, %v2692_v49, %v2686_v51  ;;  %v838_v56 = vpack.c.bf16 %v832_v12, %v832_v12  ;;  %v2702_v17 = vunpack.i.h.bf16 %v2700_v61 }
  0x97   :  { %2480 = vmatprep.subr.msk.bf16.mxu1 %vm3554_vm3, %v594_v57  ;;  %v963_v57 = vsel %vm3134_vm5, %v951_v15, 0.0  ;;  %v965_v59 = vsel %vm3144_vm15, %v953_v55, 0.0  ;;  %v952_v7 = vsel %vm3551_vm10, %v2686_v51, %v2687_v48  ;;  %vm3555_vm8 = vcmp.lt.s32.totalorder %v2903_v10, 112 }
  0x98   :  { %v844_v60 = vsel %vm3554_vm3, %v836_v19, 0  ;;  %v971_v9 = vpack.c.bf16 %v965_v59, %v965_v59  ;;  %v2696_v22 = vunpack.i.l.bf16 %v2695_v62  ;;  %vm3582_vm1 = vcmp.ne.s32.totalorder %v2922_v20, 0 }
  0x99   :  { %v962_v23 = vsel %vm3582_vm1, %v952_v7, 0.0  ;;  %v2707_v46 = vunpack.i.h.bf16 %v2705_v39  ;;  %vm3558_vm1 = vcmp.lt.s32.totalorder %v2903_v10, 111  ;;  %v2706_v48 = vunpack.i.l.bf16 %v2705_v39 }
  0x9a   :  { %v968_v27 = vpack.c.bf16 %v962_v23, %v962_v23  ;;  %v1085_v28 = vsel %vm3555_vm8, %v2702_v17, %v2696_v22  ;;  %v3585_v52 = vmov 0  ;;  %v3588_v19 = vmov 0 }
  0x9b   :  { %v1097_v35 = vsel %vm3123_vm7, %v1085_v28, 0.0 }
  0x9c   :  { %v1103_v44 = vpack.c.bf16 %v1097_v35, %v1097_v35 }
  0x9f   :  { %2474 = vmatmul.mubr.msk.bf16.vlgmr.msra.gmra.mrb[0].mxu0 %vm3553_vm9, %v2472_v63 }
  0xa0   :  { %2476 = vmatmul.mubr.msk.bf16.vlgmr.msra.gmra.mrb[0].mxu1 %vm3553_vm9, %v2472_v63  ;;  %611 = vmatpush1.bf16.msra.mxu0 %v599_v6  ;;  %v850_v63 = vsel %vm3554_vm3, %v838_v56, 0  ;;  %v969_v6 = vpack.c.bf16 %v963_v57, %v963_v57 }
  0xa1   :  { %652 = vmatpush1.bf16.msra.mxu1 %v605_v11  ;;  %642 = vmatprep.mubr.bf16.mxu0 %v2824_v8  ;;  %v950_v11 = vsel %vm3551_vm10, %v2691_v47, %v2692_v49  ;;  %vm3583_vm10 = vcmp.ne.s32.totalorder %v2924_v21, 0  ;;  %v2712_v47 = vunpack.i.h.bf16 %v2710_v38 }
  0xa2   :  { %683 = vmatprep.mubr.bf16.mxu1 %v2824_v8  ;;  %2487 = vmatprep.subr.msk.bf16.mxu0 %vm3554_vm3, %v2484_v13  ;;  %v2701_v13 = vunpack.i.l.bf16 %v2700_v61  ;;  %v964_v25 = vsel %vm3583_vm10, %v950_v11, 0.0  ;;  %vm3584_vm10 = vcmp.ne.s32.totalorder %v2919_v18, 15 }
  0xa3   :  { %2489 = vmatprep.subr.msk.bf16.mxu1 %vm3554_vm3, %v2486_v16  ;;  %v2697_v16 = vunpack.i.h.bf16 %v2695_v62  ;;  %v970_v30 = vpack.c.bf16 %v964_v25, %v964_v25  ;;  %vm3202_vm0 = vmand %vm3113_vm12, %vm3584_vm10  ;;  %v1217_v55 = vsel %vm3558_vm1, %v2712_v47, %v2706_v48  ;;  %vm3590_vm10 = vcmask 1043456   ;;  %v2506_v25 = vld [vmem:[%s3534_s1 + $0x20] sm:$0xf] }
  0xa4   :  { %v1082_v51 = vsel %vm3555_vm8, %v2701_v13, %v2702_v17  ;;  %v3586_v52 = vsel %vm3202_vm0, 4294967295, %v3585_v52  ;;  %v2501_v17 = vld [vmem:[%s3534_s1 + $0x1c] sm:$0xf] }
  0xa5   :  { %v1083_v26 = vsel %vm3555_vm8, %v2697_v16, %v2701_v13  ;;  %v1084_v49 = vsel %vm3555_vm8, %v2696_v22, %v2697_v16  ;;  %v1102_v56 = vpack.c.bf16 %v1082_v51, %v1082_v51  ;;  %vm3592_vm8 = vcmask 64512  }
  0xa6   :  { %v1095_v31 = vsel %vm3113_vm12, %v1083_v26, 0.0  ;;  %v1100_v15 = vpack.c.bf16 %v1084_v49, %v1084_v49  ;;  %vm3593_vm12 = vmmov %vm3592_vm8  ;;  %v165_v26 = vpop.permute.xlu0 %164 }
  0xab   :  { %2479 = vmatmul.mubr.msk.bf16.vlgmr.msra.gmra.mrb[0].mxu0 %vm3553_vm9, %v2477_v33 }
  0xac   :  { %2481 = vmatmul.mubr.msk.bf16.vlgmr.msra.gmra.mrb[0].mxu1 %vm3553_vm9, %v2477_v33  ;;  %724 = vmatpush1.bf16.msra.mxu0 %v712_v36  ;;  %v2491_v33 = vld [vmem:[%s3534_s1 + $0x14] sm:$0xf]  ;;  %v976_v36 = vsel %vm3554_vm3, %v968_v27, 0 }
  0xad   :  { %765 = vmatpush1.bf16.msra.mxu1 %v718_v41  ;;  %755 = vmatprep.mubr.bf16.mxu0 %v2824_v8  ;;  %v982_v41 = vsel %vm3554_vm3, %v970_v30, 0 }
  0xae   :  { %796 = vmatprep.mubr.bf16.mxu1 %v2824_v8  ;;  %2492 = vmatprep.subr.msk.bf16.mxu0 %vm3554_vm3, %v837_v42  ;;  %v1101_v42 = vpack.c.bf16 %v1095_v31, %v1095_v31 }
  0xaf   :  { %2494 = vmatprep.subr.msk.bf16.mxu1 %vm3554_vm3, %v839_v45  ;;  %v2711_v45 = vunpack.i.l.bf16 %v2710_v38 }
  0xb1   :  { %v1215_v12 = vsel %vm3558_vm1, %v2707_v46, %v2711_v45  ;;  %v1214_v7 = vsel %vm3558_vm1, %v2711_v45, %v2712_v47 }
  0xb2   :  { %v1227_v57 = vsel %vm3202_vm0, %v1215_v12, 0.0  ;;  %vm3597_vm0 = vcmp.ne.s32.totalorder %v2924_v21, 15  ;;  %v1341_v12 = vld [vmem:[%s3537_s4] sm:$0xff] }
  0xb3   :  { %v1233_v62 = vpack.c.bf16 %v1227_v57, %v1227_v57  ;;  %v1228_v11 = vsel %vm3597_vm0, %v1214_v7, 0.0 }
  0xb4   :  { %v1234_v16 = vpack.c.bf16 %v1228_v11, %v1228_v11 }
  0xb7   :  { %2488 = vmatmul.mubr.msk.bf16.vlgmr.msra.gmra.mrb[0].mxu0 %vm3553_vm9, %v2482_v58 }
  0xb8   :  { %2490 = vmatmul.mubr.msk.bf16.vlgmr.msra.gmra.mrb[0].mxu1 %vm3553_vm9, %v2482_v58  ;;  %856 = vmatpush1.bf16.msra.mxu0 %v844_v60  ;;  %v2496_v58 = vld [vmem:[%s3534_s1 + $0x18] sm:$0xf]  ;;  %v1108_v60 = vsel %vm3590_vm10, %v1100_v15, 0 }
  0xb9   :  { %897 = vmatpush1.bf16.msra.mxu1 %v850_v63  ;;  %887 = vmatprep.mubr.bf16.mxu0 %v2824_v8  ;;  %v1216_v63 = vsel %vm3558_vm1, %v2706_v48, %v2707_v46 }
  0xba   :  { %928 = vmatprep.mubr.bf16.mxu1 %v2824_v8  ;;  %2497 = vmatprep.subr.msk.bf16.mxu0 %vm3554_vm3, %v969_v6 }
  0xbb   :  { %2499 = vmatprep.subr.msk.bf16.mxu1 %vm3554_vm3, %v971_v9 }
  0xc3   :  { %2493 = vmatmul.mubr.msk.bf16.vlgmr.msra.gmra.mrb[0].mxu0 %vm3553_vm9, %v2491_v33 }
  0xc4   :  { %2495 = vmatmul.mubr.msk.bf16.vlgmr.msra.gmra.mrb[0].mxu1 %vm3553_vm9, %v2491_v33  ;;  %988 = vmatpush1.bf16.msra.mxu0 %v976_v36  ;;  %vm3587_vm9 = vcmp.ne.s32.totalorder %v2931_v24, 15 }
  0xc5   :  { %1029 = vmatpush1.bf16.msra.mxu1 %v982_v41  ;;  %1019 = vmatprep.mubr.bf16.mxu0 %v2824_v8 }
  0xc6   :  { %1060 = vmatprep.mubr.bf16.mxu1 %v2824_v8  ;;  %2502 = vmatprep.subr.msk.bf16.mxu0 %vm3554_vm3, %v1101_v42 }
  0xc7   :  { %2504 = vmatprep.subr.msk.bf16.mxu1 %vm3554_vm3, %v1103_v44  ;;  %vm3212_vm3 = vmand %vm3123_vm7, %vm3587_vm9 }
  0xc8   :  { %v3589_v19 = vsel %vm3212_vm3, 4294967295, %v3588_v19  ;;  %v1229_v59 = vsel %vm3212_vm3, %v1217_v55, 0.0  ;;  %vm3591_vm9 = vmmov %vm3590_vm10  ;;  %vm3600_vm3 = vcmask 64512  }
  0xc9   :  { %v1114_v61 = vsel %vm3591_vm9, %v1102_v56, 0  ;;  %v1235_v6 = vpack.c.bf16 %v1229_v59, %v1229_v59  ;;  %vm3594_vm10 = vmmov %vm3591_vm9  ;;  %vm3595_vm9 = vcmp.ne.s32.totalorder %v2922_v20, 15 }
  0xca   :  { %v1226_v9 = vsel %vm3595_vm9, %v1216_v63, 0.0  ;;  %vm3602_vm0 = vmmov %vm3600_vm3 }
  0xcb   :  { %v1232_v13 = vpack.c.bf16 %v1226_v9, %v1226_v9  ;;  %vm3603_vm9 = vmmov %vm3602_vm0 }
  0xcf   :  { %2498 = vmatmul.mubr.msk.bf16.vlgmr.msra.gmra.mrb[0].mxu0 %vm3592_vm8, %v2496_v58  ;;  %vm3596_vm8 = vmmov %vm3594_vm10 }
  0xd0   :  { %2500 = vmatmul.mubr.msk.bf16.vlgmr.msra.gmra.mrb[0].mxu1 %vm3593_vm12, %v2496_v58  ;;  %1120 = vmatpush1.bf16.msra.mxu0 %v1108_v60  ;;  %vm3598_vm12 = vmmov %vm3596_vm8 }
  0xd1   :  { %1161 = vmatpush1.bf16.msra.mxu1 %v1114_v61  ;;  %1151 = vmatprep.mubr.bf16.mxu0 %v2824_v8  ;;  %v1240_v22 = vsel %vm3598_vm12, %v1232_v13, 0  ;;  %vm3599_vm1 = vmmov %vm3596_vm8 }
  0xd2   :  { %1192 = vmatprep.mubr.bf16.mxu1 %v2824_v8  ;;  %2507 = vmatprep.subr.msk.bf16.mxu0 %vm3594_vm10, %v1233_v62  ;;  %v1246_v23 = vsel %vm3599_vm1, %v1234_v16, 0  ;;  %vm3601_vm10 = vmmov %vm3600_vm3  ;;  %vm3605_vm1 = vcmp.ne.s32.totalorder %v2919_v18, 0 }
  0xd3   :  { %2509 = vmatprep.subr.msk.bf16.mxu1 %vm3596_vm8, %v1235_v6 }
  0xdb   :  { %2503 = vmatmul.mubr.msk.bf16.vlgmr.msra.gmra.mrb[0].mxu0 %vm3600_vm3, %v2501_v17  ;;  %vm3604_vm3 = vcmp.lt.s32.totalorder %v2903_v10, 17 }
  0xdc   :  { %2505 = vmatmul.mubr.msk.bf16.vlgmr.msra.gmra.mrb[0].mxu1 %vm3601_vm10, %v2501_v17  ;;  %1252 = vmatpush1.bf16.msra.mxu0 %v1240_v22  ;;  %vm3606_vm8 = vmmov %vm3604_vm3 }
  0xdd   :  { %1293 = vmatpush1.bf16.msra.mxu1 %v1246_v23  ;;  %1283 = vmatprep.mubr.bf16.mxu0 %v2824_v8  ;;  %vm3607_vm12 = vmmov %vm3604_vm3 }
  0xde   :  { %1324 = vmatprep.mubr.bf16.mxu1 %v2824_v8  ;;  %vm3608_vm10 = vmmov %vm3604_vm3 }
  0xe7   :  { %2508 = vmatmul.mubr.msk.bf16.vlgmr.msra.gmra.mrb[0].mxu0 %vm3602_vm0, %v2506_v25  ;;  %vm3609_vm0 = vcmp.ne.s32.totalorder %v2931_v24, 0 }
  0xe8   :  { %2510 = vmatmul.mubr.msk.bf16.vlgmr.msra.gmra.mrb[0].mxu1 %vm3603_vm9, %v2506_v25  ;;  %1415 = vmatprep.mubr.bf16.mxu0 %v2824_v8  ;;  %vm3610_vm9 = vcmask 1043456  }
  0xe9   :  { %1456 = vmatprep.mubr.bf16.mxu1 %v2824_v8 }
 0x1ba   :  { %v1285_v27 = vpop.f32.mrb[0].mxu0 }
 0x1bb   :  { %v2555_v28 = vadd.f32 %v1285_v27, %v165_v26  ;;  %v1326_v30 = vpop.f32.mrb[0].mxu1  ;;  %v1287_v31 = vpop.f32.mrb[1].mxu0 }
 0x1bc   :  { %v2557_v33 = vadd.f32 %v1326_v30, %v165_v26  ;;  %v2556_v35 = vadd.f32 %v1287_v31, %v165_v26  ;;  %v1328_v36 = vpop.f32.mrb[1].mxu1  ;;  %v1289_v38 = vpop.f32.mrb[2].mxu0 }
 0x1bd   :  { %v3257_v39 = vmax.f32 %v2555_v28, 0.0  ;;  %v2558_v41 = vadd.f32 %v1328_v36, %v165_v26  ;;  %v1330_v42 = vpop.f32.mrb[2].mxu1  ;;  %v1290_v44 = vpop.f32.mrb[3].mxu0 }
 0x1be   :  { %v3259_v45 = vmax.f32 %v2557_v33, 0.0  ;;  %v3261_v46 = vmax.f32 %v2556_v35, 0.0  ;;  %v1331_v47 = vpop.f32.mrb[3].mxu1 }
 0x1bf   :  { %v3263_v48 = vmax.f32 %v2558_v41, 0.0 }
 0x1c0   :  { %v2724_v49 = vpack.i.bf16 %v3261_v46, %v3257_v39 }
 0x1c1   :  { %v2719_v51 = vpack.i.bf16 %v3263_v48, %v3259_v45 }
 0x1c2   :  { %2725 = vrot.lane.b32.xlu0 %v2724_v49, %s2823_s23  ;;  %2715 = vrot.lane.b32.xlu1 %v2724_v49, %s2822_s22 }
 0x1c6   :  { %2735 = vrot.lane.b32.xlu0 %v2724_v49, %s2825_s0  ;;  %2720 = vrot.lane.b32.xlu1 %v2719_v51, %s2822_s22 }
 0x1ca   :  { %2745 = vrot.lane.b32.xlu0 %v2724_v49, %s2826_s24  ;;  %2730 = vrot.lane.b32.xlu1 %v2719_v51, %s2823_s23 }
 0x1ce   :  { %2755 = vrot.lane.b32.xlu0 %v2724_v49, %s2827_s25  ;;  %2740 = vrot.lane.b32.xlu1 %v2719_v51, %s2825_s0 }
 0x1d2   :  { %2765 = vrot.lane.b32.xlu0 %v2724_v49, %s2828_s26  ;;  %2750 = vrot.lane.b32.xlu1 %v2719_v51, %s2826_s24 }
 0x1d6   :  { %2775 = vrot.lane.b32.xlu0 %v2724_v49, %s2829_s27  ;;  %2760 = vrot.lane.b32.xlu1 %v2719_v51, %s2827_s25 }
 0x1da   :  { %2785 = vrot.lane.b32.xlu0 %v2724_v49, %s2830_s28  ;;  %2770 = vrot.lane.b32.xlu1 %v2719_v51, %s2828_s26 }
 0x1de   :  { %1344 = vperm.xlu0 %2713, %v1341_v12   ;;  %2780 = vrot.lane.b32.xlu1 %v2719_v51, %s2829_s27 }
 0x1e2   :  { %2790 = vrot.lane.b32.xlu1 %v2719_v51, %s2830_s28 }
 0x234   :  { %v2726_v15 = vpop.permute.xlu0 %2725  ;;  %v2716_v55 = vpop.permute.xlu1 %2715 }
 0x235   :  { %v2718_v56 = vunpack.i.h.bf16 %v2716_v55  ;;  %v2717_v57 = vunpack.i.l.bf16 %v2716_v55  ;;  %v2728_v62 = vunpack.i.h.bf16 %v2726_v15  ;;  %v2727_v63 = vunpack.i.l.bf16 %v2726_v15 }
 0x237   :  { %v1357_v58 = vsel %vm3604_vm3, %v2717_v57, %v2718_v56  ;;  %vm3611_vm3 = vcmp.lt.s32.totalorder %v2903_v10, 16 }
 0x238   :  { %v1360_v59 = vsel %vm3605_vm1, %v1357_v58, 0.0  ;;  %v2736_v60 = vpop.permute.xlu0 %2735  ;;  %v2721_v61 = vpop.permute.xlu1 %2720  ;;  %v1479_v28 = vsel %vm3611_vm3, %v2727_v63, %v2728_v62  ;;  %vm3612_vm1 = vcmp.lt.s32.totalorder %v2903_v10, 15 }
 0x239   :  { %v2723_v6 = vunpack.i.h.bf16 %v2721_v61  ;;  %v2722_v7 = vunpack.i.l.bf16 %v2721_v61  ;;  %v2738_v9 = vunpack.i.h.bf16 %v2736_v60  ;;  %v2737_v11 = vunpack.i.l.bf16 %v2736_v60 }
 0x23a   :  { %v1365_v13 = vpack.c.bf16 %v1360_v59, %v1360_v59  ;;  %v1488_v44 = vpack.c.bf16 %v1479_v28, %v1479_v28 }
 0x23b   :  { %v1355_v16 = vsel %vm3606_vm8, %v2722_v7, %v2723_v6  ;;  %v1356_v17 = vsel %vm3607_vm12, %v2718_v56, %v2722_v7  ;;  %v1358_v22 = vsel %vm3608_vm10, %v2723_v6, %v2717_v57  ;;  %v1602_v33 = vsel %vm3612_vm1, %v2737_v11, %v2738_v9  ;;  %vm3613_vm8 = vmmov %vm3611_vm3  ;;  %v1363_v57 = vld [vmem:[%s3536_s3] sm:$0xf] }
 0x23c   :  { %v1362_v23 = vsel %vm3609_vm0, %v1355_v16, 0.0  ;;  %2511 = vmatprep.subr.msk.bf16.mxu0 %vm3610_vm9, %v1365_v13  ;;  %v2731_v25 = vpop.permute.xlu1 %2730  ;;  %v1359_v26 = vsel %vm2955_vm11, %v1358_v22, 0.0  ;;  %v1361_v27 = vsel %vm2965_vm14, %v1356_v17, 0.0  ;;  %v2746_v41 = vpop.permute.xlu0 %2745  ;;  %vm3614_vm11 = vmmov %vm3611_vm3 }
 0x23d   :  { %v2733_v30 = vunpack.i.h.bf16 %v2731_v25  ;;  %v2732_v31 = vunpack.i.l.bf16 %v2731_v25  ;;  %v1367_v35 = vpack.c.bf16 %v1362_v23, %v1362_v23  ;;  %v1364_v36 = vpack.c.bf16 %v1359_v26, %v1359_v26  ;;  %vm3615_vm14 = vmmov %vm3611_vm3 }
 0x23e   :  { %v1366_v38 = vpack.c.bf16 %v1361_v27, %v1361_v27  ;;  %vm3616_vm12 = vmmov %vm3610_vm9  ;;  %v2748_v58 = vunpack.i.h.bf16 %v2746_v41  ;;  %v2747_v59 = vunpack.i.l.bf16 %v2746_v41 }
 0x23f   :  { %v1480_v42 = vsel %vm3613_vm8, %v2733_v30, %v2727_v63  ;;  %v1477_v40 = vsel %vm3614_vm11, %v2732_v31, %v2733_v30  ;;  %v1478_v43 = vsel %vm3615_vm14, %v2728_v62, %v2732_v31  ;;  %2513 = vmatprep.subr.msk.bf16.mxu1 %vm3616_vm12, %v1367_v35  ;;  %vm3617_vm10 = vmmov %vm3610_vm9  ;;  %vm3622_vm8 = vcmp.lt.s32.totalorder %v2903_v10, 15 }
 0x240   :  { %v1490_v47 = vpack.c.bf16 %v1477_v40, %v1477_v40  ;;  %v2741_v49 = vpop.permute.xlu1 %2740  ;;  %v1372_v51 = vsel %vm3617_vm10, %v1364_v36, 0  ;;  %vm3618_vm0 = vmmov %vm3610_vm9  ;;  %vm3619_vm9 = vcmp.ne.s32.totalorder %v2919_v18, 15  ;;  %v1481_v60 = vsel %vm2933_vm4, %v1480_v42, 0.0 }
 0x241   :  { %v1378_v12 = vsel %vm3618_vm0, %v1366_v38, 0  ;;  %v1605_v15 = vsel %vm3619_vm9, %v1602_v33, 0.0  ;;  %v2743_v55 = vunpack.i.h.bf16 %v2741_v49  ;;  %v2742_v56 = vunpack.i.l.bf16 %v2741_v49  ;;  %1384 = vmatpush1.bf16.msra.mxu0 %v1372_v51  ;;  %vm3620_vm3 = vmmov %vm3618_vm0  ;;  %v2515_v33 = vld [vmem:[%s3536_s3 + $0x4] sm:$0xf] }
 0x242   :  { %1425 = vmatpush1.bf16.msra.mxu1 %v1378_v12  ;;  %2516 = vmatprep.subr.msk.bf16.mxu0 %vm3620_vm3, %v1488_v44  ;;  %vm3621_vm1 = vmmov %vm3618_vm0  ;;  %v1483_v61 = vsel %vm2942_vm6, %v1478_v43, 0.0  ;;  %vm3624_vm14 = vcmp.ne.s32.totalorder %v2931_v24, 15  ;;  %vm3625_vm12 = vcmask 64512   ;;  %v1487_v13 = vpack.c.bf16 %v1481_v60, %v1481_v60  ;;  %v2756_v12 = vpop.permute.xlu0 %2755 }
 0x243   :  { %2518 = vmatprep.subr.msk.bf16.mxu1 %vm3621_vm1, %v1490_v47  ;;  %v1603_v62 = vsel %vm3622_vm8, %v2743_v55, %v2737_v11  ;;  %vm3623_vm11 = vmmov %vm3622_vm8  ;;  %v1489_v29 = vpack.c.bf16 %v1483_v61, %v1483_v61  ;;  %v1611_v16 = vpack.c.bf16 %v1605_v15, %v1605_v15  ;;  %vm3628_vm6 = vcmp.lt.s32.totalorder %v2903_v10, 1  ;;  %v2520_v15 = vld [vmem:[%s3536_s3 + $0x8] sm:$0xf] }
 0x244   :  { %v1600_v63 = vsel %vm3623_vm11, %v2742_v56, %v2743_v55  ;;  %2512 = vmatmul.mubr.msk.bf16.vlgmr.msra.gmra.mrb[4].mxu0 %vm3625_vm12, %v1363_v57  ;;  %vm3626_vm10 = vmmov %vm3625_vm12  ;;  %v2751_v7 = vpop.permute.xlu1 %2750  ;;  %v1604_v11 = vsel %vm3019_vm2, %v1603_v62, 0.0  ;;  %v1725_v23 = vsel %vm3628_vm6, %v2747_v59, %v2748_v58  ;;  %v1495_v25 = vsel %vm3618_vm0, %v1487_v13, 0 }
 0x245   :  { %v1607_v6 = vsel %vm3624_vm14, %v1600_v63, 0.0  ;;  %2514 = vmatmul.mubr.msk.bf16.vlgmr.msra.gmra.mrb[4].mxu1 %vm3626_vm10, %v1363_v57  ;;  %vm3627_vm4 = vmmov %vm3622_vm8  ;;  %v2753_v17 = vunpack.i.h.bf16 %v2751_v7  ;;  %v2752_v22 = vunpack.i.l.bf16 %v2751_v7  ;;  %1538 = vmatprep.mubr.bf16.mxu0 %v2824_v8  ;;  %vm3631_vm1 = vcmp.ne.s32.totalorder %v2931_v24, 0 }
 0x246   :  { %v1601_v32 = vsel %vm3627_vm4, %v2738_v9, %v2742_v56  ;;  %1579 = vmatprep.mubr.bf16.mxu1 %v2824_v8  ;;  %vm3629_vm9 = vmmov %vm3618_vm0  ;;  %v1613_v27 = vpack.c.bf16 %v1607_v6, %v1607_v6  ;;  %1507 = vmatpush1.bf16.msra.mxu0 %v1495_v25  ;;  %v1610_v34 = vpack.c.bf16 %v1604_v11, %v1604_v11  ;;  %vm3633_vm2 = vcmp.ne.s32.totalorder %v2919_v18, 0  ;;  %v2766_v13 = vpop.permute.xlu0 %2765 }
 0x247   :  { %v1501_v26 = vsel %vm3629_vm9, %v1489_v29, 0  ;;  %vm3630_vm3 = vmmov %vm3628_vm6  ;;  %v1606_v30 = vsel %vm3030_vm13, %v1601_v32, 0.0  ;;  %v1728_v31 = vsel %vm3633_vm2, %v1725_v23, 0.0  ;;  %vm3641_vm9 = vcmp.ne.s32.totalorder %v2924_v21, 0  ;;  %v2525_v32 = vld [vmem:[%s3536_s3 + $0xc] sm:$0xf] }
 0x248   :  { %v1723_v9 = vsel %vm3630_vm3, %v2752_v22, %v2753_v17  ;;  %1548 = vmatpush1.bf16.msra.mxu1 %v1501_v26  ;;  %vm3632_vm8 = vmmov %vm3618_vm0  ;;  %v1612_v38 = vpack.c.bf16 %v1606_v30, %v1606_v30  ;;  %v1734_v40 = vpack.c.bf16 %v1728_v31, %v1728_v31  ;;  %v2761_v47 = vpop.permute.xlu1 %2760  ;;  %v1841_v57 = vpack.c.bf16 %v3261_v46, %v3261_v46 }
 0x249   :  { %v1730_v28 = vsel %vm3631_vm1, %v1723_v9, 0.0  ;;  %2521 = vmatprep.subr.msk.bf16.mxu0 %vm3632_vm8, %v1611_v16  ;;  %vm3634_vm11 = vmmov %vm3618_vm0  ;;  %v2763_v55 = vunpack.i.h.bf16 %v2761_v47  ;;  %v2762_v56 = vunpack.i.l.bf16 %v2761_v47  ;;  %v2757_v60 = vunpack.i.l.bf16 %v2756_v12 }
 0x24a   :  { %2523 = vmatprep.subr.msk.bf16.mxu1 %vm3634_vm11, %v1613_v27  ;;  %vm3635_vm14 = vmmov %vm3630_vm3  ;;  %v1736_v41 = vpack.c.bf16 %v1730_v28, %v1730_v28  ;;  %v1840_v6 = vpack.c.bf16 %v3257_v39, %v3257_v39  ;;  %v1842_v7 = vpack.c.bf16 %v3259_v45, %v3259_v45  ;;  %v2768_v23 = vunpack.i.h.bf16 %v2766_v13  ;;  %v2776_v31 = vpop.permute.xlu0 %2775 }
 0x24b   :  { %v1726_v35 = vsel %vm3635_vm14, %v2753_v17, %v2747_v59  ;;  %vm3636_vm12 = vmmov %vm3630_vm3  ;;  %v2758_v59 = vunpack.i.h.bf16 %v2756_v12  ;;  %v2767_v25 = vunpack.i.l.bf16 %v2766_v13  ;;  %v2777_v47 = vunpack.i.l.bf16 %v2776_v31 }
 0x24c   :  { %v1724_v36 = vsel %vm3636_vm12, %v2748_v58, %v2752_v22  ;;  %2517 = vmatmul.mubr.msk.bf16.vlgmr.msra.gmra.mrb[8].mxu0 %vm3626_vm10, %v2515_v33  ;;  %vm3637_vm13 = vmmov %vm3626_vm10  ;;  %v1843_v58 = vpack.c.bf16 %v3263_v48, %v3263_v48  ;;  %vm3648_vm12 = vcmp.lt.s32.totalorder %v2903_v10, 127  ;;  %v2771_v48 = vpop.permute.xlu1 %2770 }
 0x24d   :  { %2519 = vmatmul.mubr.msk.bf16.vlgmr.msra.gmra.mrb[8].mxu1 %vm3637_vm13, %v2515_v33  ;;  %vm3638_vm4 = vmmov %vm3618_vm0  ;;  %v1729_v44 = vsel %vm3641_vm9, %v1724_v36, 0.0  ;;  %1661 = vmatprep.mubr.bf16.mxu0 %v2824_v8  ;;  %v1956_v63 = vsel %vm3648_vm12, %v2763_v55, %v2757_v60  ;;  %v2773_v22 = vunpack.i.h.bf16 %v2771_v48  ;;  %v2772_v11 = vunpack.i.l.bf16 %v2771_v48 }
 0x24e   :  { %v1618_v37 = vsel %vm3638_vm4, %v1610_v34, 0  ;;  %vm3639_vm6 = vmmov %vm3618_vm0  ;;  %vm3640_vm0 = vcmp.ne.s32.totalorder %v2922_v20, 0  ;;  %1702 = vmatprep.mubr.bf16.mxu1 %v2824_v8  ;;  %v1735_v51 = vpack.c.bf16 %v1729_v44, %v1729_v44  ;;  %v2778_v44 = vunpack.i.h.bf16 %v2776_v31  ;;  %v2550_v31 = vld [vmem:[%s3536_s3 + $0x20] sm:$0xf] }
 0x24f   :  { %v1624_v42 = vsel %vm3639_vm6, %v1612_v38, 0  ;;  %1630 = vmatpush1.bf16.msra.mxu0 %v1618_v37  ;;  %v1727_v43 = vsel %vm3640_vm0, %v1726_v35, 0.0  ;;  %vm3642_vm3 = vmmov %vm3638_vm4  ;;  %vm3652_vm6 = vcmp.ne.s32.totalorder %v2931_v24, 15  ;;  %vm3653_vm0 = vcmp.ne.s32.totalorder %v2919_v18, 15 }
 0x250   :  { %1671 = vmatpush1.bf16.msra.mxu1 %v1624_v42  ;;  %2526 = vmatprep.subr.msk.bf16.mxu0 %vm3642_vm3, %v1734_v40  ;;  %vm3643_vm1 = vmmov %vm3642_vm3  ;;  %v1733_v49 = vpack.c.bf16 %v1727_v43, %v1727_v43  ;;  %v1960_v29 = vsel %vm3652_vm6, %v1956_v63, 0.0  ;;  %v2781_v30 = vpop.permute.xlu1 %2780  ;;  %v2535_v63 = vld [vmem:[%s3536_s3 + $0x14] sm:$0xf] }
 0x251   :  { %2528 = vmatprep.subr.msk.bf16.mxu1 %vm3643_vm1, %v1736_v41  ;;  %vm3644_vm8 = vmmov %vm3626_vm10  ;;  %v1848_v45 = vsel %vm3643_vm1, %v1840_v6, 0  ;;  %v1966_v26 = vpack.c.bf16 %v1960_v29, %v1960_v29  ;;  %v2530_v41 = vld [vmem:[%s3536_s3 + $0x10] sm:$0xf]  ;;  %v2783_v40 = vunpack.i.h.bf16 %v2781_v30  ;;  %v2782_v43 = vunpack.i.l.bf16 %v2781_v30  ;;  %v2545_v30 = vld [vmem:[%s3536_s3 + $0x1c] sm:$0xf] }
 0x252   :  { %vm3645_vm2 = vmmov %vm3644_vm8 }
 0x253   :  { %vm3646_vm11 = vmmov %vm3643_vm1 }
 0x254   :  { %2522 = vmatmul.mubr.msk.bf16.vlgmr.msra.gmra.mrb[12].mxu0 %vm3644_vm8, %v2520_v15  ;;  %v1741_v61 = vsel %vm3646_vm11, %v1733_v49, 0  ;;  %vm3647_vm14 = vmmov %vm3643_vm1 }
 0x255   :  { %2524 = vmatmul.mubr.msk.bf16.vlgmr.msra.gmra.mrb[12].mxu1 %vm3645_vm2, %v2520_v15  ;;  %v1747_v62 = vsel %vm3647_vm14, %v1735_v51, 0  ;;  %1753 = vmatpush1.bf16.msra.mxu0 %v1741_v61  ;;  %vm3649_vm10 = vmmov %vm3648_vm12  ;;  %vm3658_vm14 = vcmp.ne.s32.totalorder %v2922_v20, 15  ;;  %vm3659_vm12 = vcmp.ne.s32.totalorder %v2924_v21, 15 }
 0x256   :  { %1794 = vmatpush1.bf16.msra.mxu1 %v1747_v62  ;;  %v1954_v46 = vsel %vm3649_vm10, %v2758_v59, %v2762_v56  ;;  %vm3650_vm13 = vmmov %vm3643_vm1  ;;  %1784 = vmatprep.mubr.bf16.mxu0 %v2824_v8 }
 0x257   :  { %2531 = vmatprep.subr.msk.bf16.mxu0 %vm3650_vm13, %v1841_v57  ;;  %vm3651_vm4 = vmmov %vm3643_vm1  ;;  %1825 = vmatprep.mubr.bf16.mxu1 %v2824_v8  ;;  %v1958_v16 = vsel %vm3653_vm0, %v1954_v46, 0.0  ;;  %v2791_v57 = vpop.permute.xlu1 %2790 }
 0x258   :  { %2533 = vmatprep.subr.msk.bf16.mxu1 %vm3651_vm4, %v1843_v58  ;;  %vm3654_vm9 = vmmov %vm3649_vm10  ;;  %v1964_v18 = vpack.c.bf16 %v1958_v16, %v1958_v16  ;;  %vm3660_vm10 = vcmp.lt.s32.totalorder %v2903_v10, 113  ;;  %v2786_v58 = vpop.permute.xlu0 %2785  ;;  %v2793_v46 = vunpack.i.h.bf16 %v2791_v57  ;;  %v2792_v48 = vunpack.i.l.bf16 %v2791_v57 }
 0x259   :  { %v1955_v17 = vsel %vm3654_vm9, %v2757_v60, %v2758_v59  ;;  %vm3655_vm3 = vmmov %vm3654_vm9  ;;  %v2079_v28 = vsel %vm3660_vm10, %v2773_v22, %v2767_v25  ;;  %v2788_v6 = vunpack.i.h.bf16 %v2786_v58 }
 0x25a   :  { %v1953_v39 = vsel %vm3655_vm3, %v2762_v56, %v2763_v55  ;;  %vm3656_vm8 = vmmov %vm3643_vm1  ;;  %v1957_v27 = vsel %vm3658_vm14, %v1955_v17, 0.0  ;;  %v2083_v36 = vsel %vm3144_vm15, %v2079_v28, 0.0 }
 0x25b   :  { %v1854_v24 = vsel %vm3656_vm8, %v1842_v7, 0  ;;  %vm3657_vm11 = vmmov %vm3645_vm2  ;;  %v1959_v9 = vsel %vm3659_vm12, %v1953_v39, 0.0  ;;  %v1963_v33 = vpack.c.bf16 %v1957_v27, %v1957_v27  ;;  %v2089_v51 = vpack.c.bf16 %v2083_v36, %v2083_v36 }
 0x25c   :  { %2527 = vmatmul.mubr.msk.bf16.vlgmr.msra.gmra.mrb[16].mxu0 %vm3645_vm2, %v2525_v32  ;;  %vm3661_vm13 = vmmov %vm3660_vm10  ;;  %v1965_v35 = vpack.c.bf16 %v1959_v9, %v1959_v9  ;;  %vm3669_vm8 = vcmp.ne.s32.totalorder %v2922_v20, 0  ;;  %v2787_v7 = vunpack.i.l.bf16 %v2786_v58 }
 0x25d   :  { %2529 = vmatmul.mubr.msk.bf16.vlgmr.msra.gmra.mrb[16].mxu1 %vm3657_vm11, %v2525_v32  ;;  %1860 = vmatpush1.bf16.msra.mxu0 %v1848_v45  ;;  %v2077_v34 = vsel %vm3661_vm13, %v2768_v23, %v2772_v11  ;;  %vm3662_vm4 = vmmov %vm3643_vm1  ;;  %v1971_v14 = vsel %vm3643_vm1, %v1963_v33, 0  ;;  %vm3671_vm11 = vcmp.lt.s32.totalorder %v2903_v10, 112  ;;  %vm3675_vm13 = vnez %v3574_v50 }
 0x25e   :  { %1901 = vmatpush1.bf16.msra.mxu1 %v1854_v24  ;;  %2536 = vmatprep.subr.msk.bf16.mxu0 %vm3662_vm4, %v1964_v18  ;;  %vm3663_vm6 = vmmov %vm3643_vm1  ;;  %v2081_v38 = vsel %vm3134_vm5, %v2077_v34, 0.0  ;;  %v2202_v55 = vsel %vm3671_vm11, %v2783_v40, %v2777_v47 }
 0x25f   :  { %2538 = vmatprep.subr.msk.bf16.mxu1 %vm3663_vm6, %v1966_v26  ;;  %1891 = vmatprep.mubr.bf16.mxu0 %v2824_v8  ;;  %vm3664_vm0 = vmmov %vm3660_vm10  ;;  %v2087_v49 = vpack.c.bf16 %v2081_v38, %v2081_v38  ;;  %v2206_v61 = vsel %vm3123_vm7, %v2202_v55, 0.0 }
 0x260   :  { %1932 = vmatprep.mubr.bf16.mxu1 %v2824_v8  ;;  %v2078_v37 = vsel %vm3664_vm0, %v2767_v25, %v2768_v23  ;;  %vm3665_vm9 = vmmov %vm3664_vm0  ;;  %v2212_v16 = vpack.c.bf16 %v2206_v61, %v2206_v61  ;;  %v2540_v23 = vld [vmem:[%s3536_s3 + $0x18] sm:$0xf]  ;;  %s2831_s3 = smov [#allocation2]  }
 0x261   :  { %v2076_v42 = vsel %vm3665_vm9, %v2772_v11, %v2773_v22  ;;  %vm3666_vm3 = vmmov %vm3645_vm2  ;;  %v2080_v12 = vsel %vm3669_vm8, %v2078_v37, 0.0  ;;  %s2455_s14 = sshll.u32 %s2831_s3, 4  ;;  %s2456_s14 = int_to_ptr.vmem [resolvable:$true] %s2455_s14 }
 0x262   :  { %vm3667_vm15 = vmmov %vm3645_vm2  ;;  %vm3670_vm2 = vcmp.ne.s32.totalorder %v2924_v21, 0  ;;  %v2086_v59 = vpack.c.bf16 %v2080_v12, %v2080_v12  ;;  %s2798_s15 = scalar_lea.vmem %s2456_s14, 512  ;;  %p2803_p1 = scmp.lt.s32.totalorder %s2456_s14, %s2456_s14 }
 0x263   :  { %vm3668_vm5 = vmmov %vm3643_vm1  ;;  %v2082_v15 = vsel %vm3670_vm2, %v2076_v42, 0.0  ;;  %vm3686_vm2 = vnez %v3589_v19  ;;  %p2799_p0 = scmp.ne.s32.totalorder %s2456_s14, %s2798_s15  ;;  %p2804_p2 = scmp.lt.s32.totalorder %s2798_s15, %s2798_s15 }
 0x264   :  { %2532 = vmatmul.mubr.msk.bf16.vlgmr.msra.gmra.mrb[20].mxu0 %vm3666_vm3, %v2530_v41  ;;  %v1977_v54 = vsel %vm3668_vm5, %v1965_v35, 0  ;;  %vm3672_vm14 = vmmov %vm3671_vm11  ;;  %v2088_v60 = vpack.c.bf16 %v2082_v15, %v2082_v15 }
 0x265   :  { %2534 = vmatmul.mubr.msk.bf16.vlgmr.msra.gmra.mrb[20].mxu1 %vm3667_vm15, %v2530_v41  ;;  %1983 = vmatpush1.bf16.msra.mxu0 %v1971_v14  ;;  %v2200_v56 = vsel %vm3672_vm14, %v2778_v44, %v2782_v43  ;;  %vm3673_vm12 = vmmov %vm3643_vm1  ;;  %vm3682_vm15 = vcmp.lt.s32.totalorder %v2903_v10, 111  ;;  %p2805_p3 = por %p2804_p2, %p2803_p1 }
 0x266   :  { %2024 = vmatpush1.bf16.msra.mxu1 %v1977_v54  ;;  %2541 = vmatprep.subr.msk.bf16.mxu0 %vm3673_vm12, %v2087_v49  ;;  %vm3674_vm10 = vmmov %vm3643_vm1  ;;  %v2204_v62 = vsel %vm3675_vm13, %v2200_v56, 0.0  ;;  %v2325_v17 = vsel %vm3682_vm15, %v2793_v46, %v2787_v7 }
 0x267   :  { %2543 = vmatprep.subr.msk.bf16.mxu1 %vm3674_vm10, %v2089_v51  ;;  %2014 = vmatprep.mubr.bf16.mxu0 %v2824_v8  ;;  %vm3676_vm4 = vmmov %vm3666_vm3  ;;  %v2210_v29 = vpack.c.bf16 %v2204_v62, %v2204_v62  ;;  %v2329_v45 = vsel %vm3686_vm2, %v2325_v17, 0.0  ;;  %p2806_p4 = pnand %p2805_p3, %p2799_p0 }
 0x268   :  { %2055 = vmatprep.mubr.bf16.mxu1 %v2824_v8  ;;  %vm3677_vm6 = vmmov %vm3666_vm3  ;;  %v2335_v26 = vpack.c.bf16 %v2329_v45, %v2329_v45 }
 0x269   :  { %vm3678_vm0 = vmmov %vm3643_vm1 }
 0x26a   :  { %v2094_v13 = vsel %vm3678_vm0, %v2086_v59, 0  ;;  %vm3679_vm9 = vmmov %vm3678_vm0 }
 0x26b   :  { %v2100_v53 = vsel %vm3679_vm9, %v2088_v60, 0  ;;  %vm3680_vm7 = vmmov %vm3671_vm11  ;;  %vm3687_vm11 = vnez %v3586_v52  ;;  %vm3695_vm9 = vcmp.ne.s32.totalorder %v2924_v21, 15 }
 0x26c   :  { %2537 = vmatmul.mubr.msk.bf16.vlgmr.msra.gmra.mrb[24].mxu0 %vm3676_vm4, %v2535_v63  ;;  %v2201_v50 = vsel %vm3680_vm7, %v2777_v47, %v2778_v44  ;;  %vm3681_vm3 = vmmov %vm3680_vm7 }
 0x26d   :  { %2539 = vmatmul.mubr.msk.bf16.vlgmr.msra.gmra.mrb[24].mxu1 %vm3677_vm6, %v2535_v63  ;;  %2106 = vmatpush1.bf16.msra.mxu0 %v2094_v13  ;;  %v2199_v32 = vsel %vm3681_vm3, %v2782_v43, %v2783_v40  ;;  %vm3683_vm1 = vmmov %vm3682_vm15  ;;  %v2209_v22 = vpack.c.bf16 %v2201_v50, %v2201_v50  ;;  %v1345_v43 = vpop.permute.xlu0 %1344 }
 0x26e   :  { %2147 = vmatpush1.bf16.msra.mxu1 %v2100_v53  ;;  %v2323_v39 = vsel %vm3683_vm1, %v2788_v6, %v2792_v48  ;;  %vm3684_vm5 = vmmov %vm3678_vm0  ;;  %2137 = vmatprep.mubr.bf16.mxu0 %v2824_v8  ;;  %v2211_v11 = vpack.c.bf16 %v2199_v32, %v2199_v32 }
 0x26f   :  { %2546 = vmatprep.subr.msk.bf16.mxu0 %vm3684_vm5, %v2210_v29  ;;  %vm3685_vm8 = vmmov %vm3678_vm0  ;;  %2178 = vmatprep.mubr.bf16.mxu1 %v2824_v8  ;;  %v2327_v24 = vsel %vm3687_vm11, %v2323_v39, 0.0 }
 0x270   :  { %2548 = vmatprep.subr.msk.bf16.mxu1 %vm3685_vm8, %v2212_v16  ;;  %vm3688_vm14 = vmmov %vm3683_vm1  ;;  %v2333_v27 = vpack.c.bf16 %v2327_v24, %v2327_v24 }
 0x271   :  { %v2324_v25 = vsel %vm3688_vm14, %v2787_v7, %v2788_v6  ;;  %vm3689_vm12 = vmmov %vm3683_vm1 }
 0x272   :  { %v2322_v18 = vsel %vm3689_vm12, %v2792_v48, %v2793_v46  ;;  %vm3690_vm10 = vmmov %vm3676_vm4 }
 0x273   :  { %vm3691_vm13 = vmmov %vm3676_vm4  ;;  %v2328_v28 = vsel %vm3695_vm9, %v2322_v18, 0.0 }
 0x274   :  { %2542 = vmatmul.mubr.msk.bf16.vlgmr.msra.gmra.mrb[28].mxu0 %vm3690_vm10, %v2540_v23  ;;  %vm3692_vm4 = vmmov %vm3678_vm0  ;;  %v2334_v34 = vpack.c.bf16 %v2328_v28, %v2328_v28 }
 0x275   :  { %2544 = vmatmul.mubr.msk.bf16.vlgmr.msra.gmra.mrb[28].mxu1 %vm3691_vm13, %v2540_v23  ;;  %v2217_v19 = vsel %vm3692_vm4, %v2209_v22, 0  ;;  %vm3693_vm6 = vmmov %vm3678_vm0  ;;  %vm3694_vm0 = vcmp.ne.s32.totalorder %v2922_v20, 15  ;;  %2260 = vmatprep.mubr.bf16.mxu0 %v2824_v8 }
 0x276   :  { %v2223_v52 = vsel %vm3693_vm6, %v2211_v11, 0  ;;  %2229 = vmatpush1.bf16.msra.mxu0 %v2217_v19  ;;  %v2326_v9 = vsel %vm3694_vm0, %v2324_v25, 0.0  ;;  %vm3696_vm7 = vmmov %vm3692_vm4  ;;  %2301 = vmatprep.mubr.bf16.mxu1 %v2824_v8 }
 0x277   :  { %2270 = vmatpush1.bf16.msra.mxu1 %v2223_v52  ;;  %2551 = vmatprep.subr.msk.bf16.mxu0 %vm3696_vm7, %v2333_v27  ;;  %vm3697_vm3 = vmmov %vm3692_vm4  ;;  %v2332_v10 = vpack.c.bf16 %v2326_v9, %v2326_v9 }
 0x278   :  { %2553 = vmatprep.subr.msk.bf16.mxu1 %vm3697_vm3, %v2335_v26  ;;  %vm3698_vm15 = vmmov %vm3690_vm10 }
 0x279   :  { %vm3699_vm1 = vmmov %vm3690_vm10 }
 0x27a   :  { %vm3700_vm5 = vmmov %vm3697_vm3 }
 0x27b   :  { %v2340_v20 = vsel %vm3700_vm5, %v2332_v10, 0  ;;  %vm3701_vm8 = vmmov %vm3697_vm3 }
 0x27c   :  { %2547 = vmatmul.mubr.msk.bf16.vlgmr.msra.gmra.mrb[32].mxu0 %vm3698_vm15, %v2545_v30  ;;  %v2346_v21 = vsel %vm3701_vm8, %v2334_v34, 0  ;;  %vm3702_vm2 = vmmov %vm3699_vm1 }
 0x27d   :  { %2549 = vmatmul.mubr.msk.bf16.vlgmr.msra.gmra.mrb[32].mxu1 %vm3699_vm1, %v2545_v30  ;;  %2352 = vmatpush1.bf16.msra.mxu0 %v2340_v20  ;;  %vm3703_vm11 = vmmov %vm3699_vm1 }
 0x27e   :  { %2393 = vmatpush1.bf16.msra.mxu1 %v2346_v21  ;;  %2383 = vmatprep.mubr.bf16.mxu0 %v2824_v8 }
 0x27f   :  { %2424 = vmatprep.mubr.bf16.mxu1 %v2824_v8 }
 0x284   :  { %2552 = vmatmul.mubr.msk.bf16.vlgmr.msra.gmra.mrb[36].mxu0 %vm3702_vm2, %v2550_v31 }
 0x285   :  { %2554 = vmatmul.mubr.msk.bf16.vlgmr.msra.gmra.mrb[36].mxu1 %vm3703_vm11, %v2550_v31 }
 0x317   :  { %v1417_v33 = vpop.f32.mrb[4].mxu0 }
 0x318   :  { %v1458_v35 = vpop.f32.mrb[4].mxu1  ;;  %v1419_v36 = vpop.f32.mrb[5].mxu0  ;;  %v1465_v44 = vadd.f32 %v1417_v33, %v1345_v43 }
 0x319   :  { %v1460_v38 = vpop.f32.mrb[5].mxu1  ;;  %v1421_v41 = vpop.f32.mrb[6].mxu0  ;;  %v1467_v47 = vadd.f32 %v1458_v35, %v1345_v43  ;;  %v1466_v8 = vadd.f32 %v1419_v36, %v1345_v43 }
 0x31a   :  { %v1462_v37 = vpop.f32.mrb[6].mxu1  ;;  %v1422_v42 = vpop.f32.mrb[7].mxu0  ;;  %v1468_v14 = vadd.f32 %v1460_v38, %v1345_v43 }
 0x31b   :  { %v1463_v40 = vpop.f32.mrb[7].mxu1 }
 0x31f   :  { %v1540_v54 = vpop.f32.mrb[8].mxu0 }
 0x320   :  { %v1581_v49 = vpop.f32.mrb[8].mxu1  ;;  %v1588_v51 = vadd.f32 %v1540_v54, %v1465_v44  ;;  %v1542_v15 = vpop.f32.mrb[9].mxu0 }
 0x321   :  { %v1590_v12 = vadd.f32 %v1581_v49, %v1467_v47  ;;  %v1583_v55 = vpop.f32.mrb[9].mxu1  ;;  %v1589_v56 = vadd.f32 %v1542_v15, %v1466_v8  ;;  %v1544_v58 = vpop.f32.mrb[10].mxu0 }
 0x322   :  { %v1591_v57 = vadd.f32 %v1583_v55, %v1468_v14  ;;  %v1585_v59 = vpop.f32.mrb[10].mxu1  ;;  %v1545_v60 = vpop.f32.mrb[11].mxu0 }
 0x323   :  { %v1586_v61 = vpop.f32.mrb[11].mxu1 }
 0x327   :  { %v1663_v62 = vpop.f32.mrb[12].mxu0 }
 0x328   :  { %v1704_v63 = vpop.f32.mrb[12].mxu1  ;;  %v1711_v46 = vadd.f32 %v1663_v62, %v1588_v51  ;;  %v1665_v6 = vpop.f32.mrb[13].mxu0 }
 0x329   :  { %v1713_v48 = vadd.f32 %v1704_v63, %v1590_v12  ;;  %v1706_v7 = vpop.f32.mrb[13].mxu1  ;;  %v1712_v13 = vadd.f32 %v1665_v6, %v1589_v56  ;;  %v1667_v29 = vpop.f32.mrb[14].mxu0 }
 0x32a   :  { %v1714_v53 = vadd.f32 %v1706_v7, %v1591_v57  ;;  %v1708_v16 = vpop.f32.mrb[14].mxu1  ;;  %v1668_v50 = vpop.f32.mrb[15].mxu0 }
 0x32b   :  { %v1709_v32 = vpop.f32.mrb[15].mxu1 }
 0x32f   :  { %v1786_v17 = vpop.f32.mrb[16].mxu0 }
 0x330   :  { %v1827_v39 = vpop.f32.mrb[16].mxu1  ;;  %v1834_v22 = vadd.f32 %v1786_v17, %v1711_v46  ;;  %v1788_v45 = vpop.f32.mrb[17].mxu0 }
 0x331   :  { %v1836_v11 = vadd.f32 %v1827_v39, %v1713_v48  ;;  %v1829_v24 = vpop.f32.mrb[17].mxu1  ;;  %v1835_v23 = vadd.f32 %v1788_v45, %v1712_v13  ;;  %v1790_v18 = vpop.f32.mrb[18].mxu0 }
 0x332   :  { %v1837_v25 = vadd.f32 %v1829_v24, %v1714_v53  ;;  %v1831_v26 = vpop.f32.mrb[18].mxu1  ;;  %v1791_v27 = vpop.f32.mrb[19].mxu0 }
 0x333   :  { %v1832_v19 = vpop.f32.mrb[19].mxu1 }
 0x337   :  { %v1893_v52 = vpop.f32.mrb[20].mxu0 }
 0x338   :  { %v1934_v9 = vpop.f32.mrb[20].mxu1  ;;  %v1941_v28 = vadd.f32 %v1893_v52, %v1834_v22  ;;  %v1895_v34 = vpop.f32.mrb[21].mxu0 }
 0x339   :  { %v1943_v10 = vadd.f32 %v1934_v9, %v1836_v11  ;;  %v1936_v30 = vpop.f32.mrb[21].mxu1  ;;  %v1942_v20 = vadd.f32 %v1895_v34, %v1835_v23  ;;  %v1897_v31 = vpop.f32.mrb[22].mxu0 }
 0x33a   :  { %v1944_v21 = vadd.f32 %v1936_v30, %v1837_v25  ;;  %v1938_v33 = vpop.f32.mrb[22].mxu1  ;;  %v1898_v35 = vpop.f32.mrb[23].mxu0 }
 0x33b   :  { %v1939_v36 = vpop.f32.mrb[23].mxu1 }
 0x33f   :  { %v2016_v38 = vpop.f32.mrb[24].mxu0 }
 0x340   :  { %v2057_v41 = vpop.f32.mrb[24].mxu1  ;;  %v2064_v37 = vadd.f32 %v2016_v38, %v1941_v28  ;;  %v2018_v40 = vpop.f32.mrb[25].mxu0 }
 0x341   :  { %v2066_v42 = vadd.f32 %v2057_v41, %v1943_v10  ;;  %v2059_v43 = vpop.f32.mrb[25].mxu1  ;;  %v2065_v44 = vadd.f32 %v2018_v40, %v1942_v20  ;;  %v2020_v8 = vpop.f32.mrb[26].mxu0 }
 0x342   :  { %v2067_v47 = vadd.f32 %v2059_v43, %v1944_v21  ;;  %v2061_v14 = vpop.f32.mrb[26].mxu1  ;;  %v2021_v54 = vpop.f32.mrb[27].mxu0 }
 0x343   :  { %v2062_v49 = vpop.f32.mrb[27].mxu1 }
 0x347   :  { %v2139_v51 = vpop.f32.mrb[28].mxu0 }
 0x348   :  { %v2180_v12 = vpop.f32.mrb[28].mxu1  ;;  %v2187_v15 = vadd.f32 %v2139_v51, %v2064_v37  ;;  %v2141_v56 = vpop.f32.mrb[29].mxu0 }
 0x349   :  { %v2189_v55 = vadd.f32 %v2180_v12, %v2066_v42  ;;  %v2182_v57 = vpop.f32.mrb[29].mxu1  ;;  %v2188_v58 = vadd.f32 %v2141_v56, %v2065_v44  ;;  %v2143_v60 = vpop.f32.mrb[30].mxu0 }
 0x34a   :  { %v2190_v59 = vadd.f32 %v2182_v57, %v2067_v47  ;;  %v2184_v61 = vpop.f32.mrb[30].mxu1  ;;  %v2144_v62 = vpop.f32.mrb[31].mxu0 }
 0x34b   :  { %v2185_v63 = vpop.f32.mrb[31].mxu1 }
 0x34f   :  { %v2262_v46 = vpop.f32.mrb[32].mxu0 }
 0x350   :  { %v2303_v48 = vpop.f32.mrb[32].mxu1  ;;  %v2310_v6 = vadd.f32 %v2262_v46, %v2187_v15  ;;  %v2264_v13 = vpop.f32.mrb[33].mxu0 }
 0x351   :  { %v2312_v7 = vadd.f32 %v2303_v48, %v2189_v55  ;;  %v2305_v53 = vpop.f32.mrb[33].mxu1  ;;  %v2311_v29 = vadd.f32 %v2264_v13, %v2188_v58  ;;  %v2266_v50 = vpop.f32.mrb[34].mxu0 }
 0x352   :  { %v2313_v16 = vadd.f32 %v2305_v53, %v2190_v59  ;;  %v2307_v32 = vpop.f32.mrb[34].mxu1  ;;  %v2267_v17 = vpop.f32.mrb[35].mxu0 }
 0x353   :  { %v2308_v39 = vpop.f32.mrb[35].mxu1 }
 0x357   :  { %v2385_v22 = vpop.f32.mrb[36].mxu0 }
 0x358   :  { %v2426_v11 = vpop.f32.mrb[36].mxu1  ;;  %v2433_v45 = vadd.f32 %v2385_v22, %v2310_v6  ;;  %v2387_v23 = vpop.f32.mrb[37].mxu0 }
 0x359   :  { %v2435_v24 = vadd.f32 %v2426_v11, %v2312_v7  ;;  %v2428_v25 = vpop.f32.mrb[37].mxu1  ;;  %v2434_v18 = vadd.f32 %v2387_v23, %v2311_v29  ;;  %v2389_v27 = vpop.f32.mrb[38].mxu0 }
 0x35a   :  { %v2436_v26 = vadd.f32 %v2428_v25, %v2313_v16  ;;  %v2430_v19 = vpop.f32.mrb[38].mxu1  ;;  %v2437_v52 = vadd.f32 %v2433_v45, %v24_v2  ;;  %v2390_v28 = vpop.f32.mrb[39].mxu0 }
 0x35b   :  { %v2439_v9 = vadd.f32 %v2435_v24, %v26_v4  ;;  %v2431_v10 = vpop.f32.mrb[39].mxu1  ;;  %v2438_v34 = vadd.f32 %v2434_v18, %v25_v3 }
 0x35c   :  { %v2440_v30 = vadd.f32 %v2436_v26, %v27_v5  ;;  %v2441_v20 = vmax.f32 %v2437_v52, 0.0 }
 0x35d   :  { %v2443_v21 = vmax.f32 %v2439_v9, 0.0  ;;  %v2442_v31 = vmax.f32 %v2438_v34, 0.0 }
 0x35e   :  { %v2444_v33 = vmax.f32 %v2440_v30, 0.0  ;;  %2445 = vst [vmem:[#allocation2] sm:$0xff] %v2441_v20 }
 0x35f   :  { %2447 = vst [vmem:[#allocation2 + $0x10] sm:$0xff] %v2443_v21  ;;  %2446 = vst [vmem:[#allocation2 + $0x8] sm:$0xff] %v2442_v31 }
 0x360   :  { %2448 = vst [vmem:[#allocation2 + $0x18] sm:$0xff] %v2444_v33 }
 0x361   :  { %2809 = shalt.err (!%p2806_p4)
}
 0x362   :  { %s2810_s18 = scalar_lea.hbm %s3538_s5, 512 }
 0x363   :  { %p2811_p5 = scmp.ne.s32.totalorder %s3538_s5, %s2810_s18  ;;  %p2814_p6 = scmp.lt.u32.totalorder %s2810_s18, %s3538_s5 }
 0x365   :  { %p2816_p7 = pnand %p2814_p6, %p2811_p5 }
 0x367   :  { %2819 = shalt.err (!%p2816_p7)
}
 0x368   :  { %2458 = dma.vmem_to_hbm [thread:$0]  %s2456_s14, 512, %s3538_s5, [#allocation3]  }
 0x369   :  { %2820 = dma.done.wait [#allocation3], 512  }
 0x36a   :  { %2821 = vsyncadd [#allocation3], 4294966784 }
 0x36b   :  { %2462 = vsyncpa [#allocation3], 1 }

</bundles_post_ra>
